<compile_context>
chip_gen: v6e
topology: v6e:2x2x1
jax: 0.10.0
libtpu: 0.0.40
codegen_flags: <defaults>
</compile_context>

<pallas_src>
import jax
import jax.numpy as jnp
from jax import lax
from jax.experimental import pallas as pl
from jax.experimental.pallas import tpu as pltpu

# ----- tiny synthetic "BERT" config (consistent with the module's shapes) -----
HIDDEN = 32
N_HEADS = 2
HEAD_DIM = HIDDEN // N_HEADS
INTERMEDIATE = 64
N_LAYERS = 2
VOCAB = 100
MAX_POS = 16
TYPE_VOCAB = 2
NUM_SEQ_LABELS = 4
NUM_TOKEN_LABELS = 3   # unused by the reference forward (token_logits is None)
LN_EPS = 1e-12


def _layernorm(x, gamma, beta):
    mu = jnp.mean(x, axis=-1, keepdims=True)
    var = jnp.mean((x - mu) ** 2, axis=-1, keepdims=True)
    return (x - mu) * lax.rsqrt(var + LN_EPS) * gamma + beta


# ------------------------------ fused kernel ---------------------------------
def _make_fused_kernel(batch, seq):
    bs = batch * seq

    def kernel(emb_ref, mask_ref, eg_ref, eb_ref,
               wqkv_ref, bqkv_ref, wo_ref, bo_ref,
               ln1g_ref, ln1b_ref, w1_ref, b1_ref,
               w2_ref, b2_ref, ln2g_ref, ln2b_ref,
               clsw_ref, clsb_ref, labels_ref,
               hs_ref, logits_ref, loss_ref,
               ctx_ref):
        # --- embedding LayerNorm (fused into the kernel) ---
        x = _layernorm(emb_ref[...], eg_ref[...], eb_ref[...])        # (B*S, H)
        # NOTE: hidden-state writeback kept (B,S,H); last dim 32 is lane-sparse
        # but total store traffic is ~6 KB, and it avoids an in-kernel relayout.
        hs_ref[0] = x.reshape(batch, seq, HIDDEN)

        # additive attention bias built in-kernel from the raw (B, S) mask
        bias = (1.0 - mask_ref[...]) * (-10000.0)                     # (B, S)
        scale = 1.0 / (HEAD_DIM ** 0.5)

        for l in range(N_LAYERS):                                     # static unroll
            # fused QKV projection: one MXU pass -> (B*S, 3H)
            qkv = (jnp.dot(x, wqkv_ref[l], preferred_element_type=jnp.float32)
                   + bqkv_ref[l])
            for b in range(batch):                                    # static unroll
                rows = slice(b * seq, (b + 1) * seq)
                bias_b = bias[b:b + 1, :]                             # (1, S)
                for h in range(N_HEADS):                              # static unroll
                    c0 = h * HEAD_DIM
                    q = qkv[rows, c0:c0 + HEAD_DIM]
                    k = qkv[rows, HIDDEN + c0:HIDDEN + c0 + HEAD_DIM]
                    v = qkv[rows, 2 * HIDDEN + c0:2 * HIDDEN + c0 + HEAD_DIM]
                    scores = (jnp.dot(q, k.T, preferred_element_type=jnp.float32)
                              * scale + bias_b)                       # (S, S)
                    m = jnp.max(scores, axis=-1, keepdims=True)
                    p = jnp.exp(scores - m)
                    denom = jnp.sum(p, axis=-1, keepdims=True)
                    p = p * pl.reciprocal(denom, approx=True)         # EUP divide
                    # write the context head straight into scratch (no concat)
                    ctx_ref[rows, c0:c0 + HEAD_DIM] = jnp.dot(
                        p, v, preferred_element_type=jnp.float32)

            attn = (jnp.dot(ctx_ref[...], wo_ref[l],
                            preferred_element_type=jnp.float32) + bo_ref[l])
            x1 = _layernorm(x + attn, ln1g_ref[l], ln1b_ref[l])
            h1 = (jnp.dot(x1, w1_ref[l], preferred_element_type=jnp.float32)
                  + b1_ref[l])
            # TODO(synk): BERT uses exact erf-GELU; tanh approximation used here.
            h1 = jax.nn.gelu(h1, approximate=True)
            h2 = (jnp.dot(h1, w2_ref[l], preferred_element_type=jnp.float32)
                  + b2_ref[l])
            x = _layernorm(x1 + h2, ln2g_ref[l], ln2b_ref[l])
            hs_ref[l + 1] = x.reshape(batch, seq, HIDDEN)

        # --- [CLS] row selection via one-hot matmul (rows 0, S, 2S, ...) ---
        col = lax.broadcasted_iota(jnp.int32, (batch, bs), 1)
        tgt = lax.broadcasted_iota(jnp.int32, (batch, bs), 0) * seq
        sel = (col == tgt).astype(jnp.float32)                        # (B, B*S)
        cls = jnp.dot(sel, x, preferred_element_type=jnp.float32)     # (B, H)

        logits = (jnp.dot(cls, clsw_ref[...],
                          preferred_element_type=jnp.float32) + clsb_ref[...])
        logits_ref[...] = logits                                      # (B, L)

        # --- CrossEntropyLoss (mean over batch); labels read from SMEM ---
        m = jnp.max(logits, axis=-1, keepdims=True)
        lse = jnp.log(jnp.sum(jnp.exp(logits - m), axis=-1, keepdims=True)) + m
        col_l = lax.broadcasted_iota(jnp.int32, (batch, NUM_SEQ_LABELS), 1)
        row_l = lax.broadcasted_iota(jnp.int32, (batch, NUM_SEQ_LABELS), 0)
        lbl = jnp.zeros((batch, NUM_SEQ_LABELS), jnp.int32)
        for b in range(batch):                                        # static unroll
            lbl = lbl + labels_ref[b] * (row_l == b).astype(jnp.int32)
        onehot = (col_l == lbl).astype(jnp.float32)
        picked = jnp.sum(logits * onehot, axis=-1, keepdims=True)     # (B, 1)
        loss_ref[0, 0] = jnp.mean(lse - picked)

    return kernel


def fused_forward(params, emb2d, mask_f32, labels_i32):
    batch, seq = mask_f32.shape
    kernel = _make_fused_kernel(batch, seq)

    vmem = pl.BlockSpec(memory_space=pltpu.MemorySpace.VMEM)
    smem = pl.BlockSpec(memory_space=pltpu.MemorySpace.SMEM)

    hs, logits, loss = pl.pallas_call(
        kernel,
        out_shape=(
            jax.ShapeDtypeStruct((N_LAYERS + 1, batch, seq, HIDDEN), jnp.float32),
            jax.ShapeDtypeStruct((batch, NUM_SEQ_LABELS), jnp.float32),
            jax.ShapeDtypeStruct((1, 1), jnp.float32),
        ),
        in_specs=[vmem] * 18 + [smem],
        out_specs=(vmem, vmem, smem),
        scratch_shapes=[pltpu.VMEM((batch * seq, HIDDEN), jnp.float32)],
    )(emb2d, mask_f32,
      params["emb_ln_g"], params["emb_ln_b"],
      params["wqkv"], params["bqkv"], params["wo"], params["bo"],
      params["ln1_g"], params["ln1_b"], params["w1"], params["b1"],
      params["w2"], params["b2"], params["ln2_g"], params["ln2_b"],
      params["cls_w"], params["cls_b"], labels_i32)
    return hs, logits, loss


# ------------------------------- parameters -----------------------------------
def init_params(key):
    ks = iter(jax.random.split(key, 64))

    def nrm(shape, scale=0.02):
        return (scale * jax.random.normal(next(ks), shape)).astype(jnp.float32)

    def stack(make):
        return jnp.stack([make() for _ in range(N_LAYERS)], axis=0)

    return {
        "word_emb": nrm((VOCAB, HIDDEN)),
        "pos_emb": nrm((MAX_POS, HIDDEN)),
        "type_emb": nrm((TYPE_VOCAB, HIDDEN)),
        "emb_ln_g": jnp.ones((1, HIDDEN), jnp.float32),
        "emb_ln_b": jnp.zeros((1, HIDDEN), jnp.float32),
        # packed per-layer weights (leading dim = N_LAYERS); Q/K/V fused.
        "wqkv": stack(lambda: nrm((HIDDEN, 3 * HIDDEN))),
        "bqkv": jnp.zeros((N_LAYERS, 1, 3 * HIDDEN), jnp.float32),
        "wo": stack(lambda: nrm((HIDDEN, HIDDEN))),
        "bo": jnp.zeros((N_LAYERS, 1, HIDDEN), jnp.float32),
        "ln1_g": jnp.ones((N_LAYERS, 1, HIDDEN), jnp.float32),
        "ln1_b": jnp.zeros((N_LAYERS, 1, HIDDEN), jnp.float32),
        "w1": stack(lambda: nrm((HIDDEN, INTERMEDIATE))),
        "b1": jnp.zeros((N_LAYERS, 1, INTERMEDIATE), jnp.float32),
        "w2": stack(lambda: nrm((INTERMEDIATE, HIDDEN))),
        "b2": jnp.zeros((N_LAYERS, 1, HIDDEN), jnp.float32),
        "ln2_g": jnp.ones((N_LAYERS, 1, HIDDEN), jnp.float32),
        "ln2_b": jnp.zeros((N_LAYERS, 1, HIDDEN), jnp.float32),
        "cls_w": nrm((HIDDEN, NUM_SEQ_LABELS)),
        "cls_b": jnp.zeros((1, NUM_SEQ_LABELS), jnp.float32),
    }


# ------------------------------ forward (glue) --------------------------------
def custom_multitask_forward(params, input_ids, attention_mask,
                             token_type_ids=None, labels=None):
    batch, seq = input_ids.shape
    if token_type_ids is None:
        token_type_ids = jnp.zeros_like(input_ids)

    # Embedding gather stays in JAX (16 rows of 32 floats); its LayerNorm is
    # fused into the Pallas kernel.
    emb = (params["word_emb"][input_ids]
           + params["pos_emb"][:seq][None, :, :]
           + params["type_emb"][token_type_ids]).astype(jnp.float32)
    emb2d = emb.reshape(batch * seq, HIDDEN)

    mask_f32 = attention_mask.astype(jnp.float32)
    if labels is not None:
        labels_i32 = labels.astype(jnp.int32).reshape(batch)
    else:
        labels_i32 = jnp.zeros((batch,), jnp.int32)

    hs, sequence_logits, loss2d = fused_forward(params, emb2d, mask_f32,
                                                labels_i32)

    hidden_states = tuple(hs[i] for i in range(N_LAYERS + 1))
    total_loss = loss2d[0, 0] if labels is not None else 0.0
    # mlm_logits / token_logits are None in the reference forward; the second
    # loss branch there would dereference None, so it is never taken.
    return {
        "loss": total_loss,
        "mlm_logits": None,
        "sequence_logits": sequence_logits,
        "token_logits": None,
        "hidden_states": hidden_states,
        "attentions": None,
    }


# ----------------------------------- main --------------------------------------
if __name__ == "__main__":
    key = jax.random.PRNGKey(0)
    pkey, ikey, lkey = jax.random.split(key, 3)

    params = init_params(pkey)

    B, S = 2, 8
    input_ids = jax.random.randint(ikey, (B, S), 0, VOCAB, dtype=jnp.int32)
    attention_mask = jnp.ones((B, S), jnp.int32).at[1, 6:].set(0)  # some padding
    token_type_ids = jnp.zeros((B, S), jnp.int32)
    labels = jax.random.randint(lkey, (B,), 0, NUM_SEQ_LABELS, dtype=jnp.int32)

    out = custom_multitask_forward(params, input_ids, attention_mask,
                                   token_type_ids=token_type_ids, labels=labels)
    jax.block_until_ready((out["loss"], out["sequence_logits"],
                           out["hidden_states"][-1]))
    print("KERNEL_OK")
</pallas_src>

<mosaic_0001>
module attributes {stable_mosaic.version = 11 : i64} {
  func.func @kernel(%arg0: memref<16x32xf32, #tpu.memory_space<vmem>>, %arg1: memref<2x8xf32, #tpu.memory_space<vmem>>, %arg2: memref<1x32xf32, #tpu.memory_space<vmem>>, %arg3: memref<1x32xf32, #tpu.memory_space<vmem>>, %arg4: memref<2x32x96xf32, #tpu.memory_space<vmem>>, %arg5: memref<2x1x96xf32, #tpu.memory_space<vmem>>, %arg6: memref<2x32x32xf32, #tpu.memory_space<vmem>>, %arg7: memref<2x1x32xf32, #tpu.memory_space<vmem>>, %arg8: memref<2x1x32xf32, #tpu.memory_space<vmem>>, %arg9: memref<2x1x32xf32, #tpu.memory_space<vmem>>, %arg10: memref<2x32x64xf32, #tpu.memory_space<vmem>>, %arg11: memref<2x1x64xf32, #tpu.memory_space<vmem>>, %arg12: memref<2x64x32xf32, #tpu.memory_space<vmem>>, %arg13: memref<2x1x32xf32, #tpu.memory_space<vmem>>, %arg14: memref<2x1x32xf32, #tpu.memory_space<vmem>>, %arg15: memref<2x1x32xf32, #tpu.memory_space<vmem>>, %arg16: memref<32x4xf32, #tpu.memory_space<vmem>>, %arg17: memref<1x4xf32, #tpu.memory_space<vmem>>, %arg18: memref<2xi32, #tpu.memory_space<smem>>, %arg19: memref<3x2x8x32xf32, #tpu.memory_space<vmem>>, %arg20: memref<2x4xf32, #tpu.memory_space<vmem>>, %arg21: memref<1x1xf32, #tpu.memory_space<smem>>, %arg22: memref<16x32xf32, #tpu.memory_space<vmem>>) attributes {dimension_semantics = [], scalar_prefetch = 0 : i64, scratch_operands = 1 : i64, tpu.core_type = #tpu.core_type<tc>} {
    %c0 = arith.constant 0 : index
    %c0_0 = arith.constant 0 : index
    %0 = vector.load %arg0[%c0, %c0_0] : memref<16x32xf32, #tpu.memory_space<vmem>>, vector<16x32xf32>
    %c0_1 = arith.constant 0 : index
    %c0_2 = arith.constant 0 : index
    %1 = vector.load %arg2[%c0_1, %c0_2] : memref<1x32xf32, #tpu.memory_space<vmem>>, vector<1x32xf32>
    %c0_3 = arith.constant 0 : index
    %c0_4 = arith.constant 0 : index
    %2 = vector.load %arg3[%c0_3, %c0_4] : memref<1x32xf32, #tpu.memory_space<vmem>>, vector<1x32xf32>
    %cst = arith.constant dense<0.000000e+00> : vector<16xf32>
    %3 = vector.multi_reduction <add>, %0, %cst [1] : vector<16x32xf32> to vector<16xf32>
    %4 = vector.shape_cast %3 : vector<16xf32> to vector<16x1xf32>
    %cst_5 = arith.constant 3.200000e+01 : f32
    %5 = vector.broadcast %cst_5 : f32 to vector<16x1xf32>
    %6 = arith.divf %4, %5 : vector<16x1xf32>
    %7 = vector.broadcast %6 : vector<16x1xf32> to vector<16x32xf32>
    %8 = arith.subf %0, %7 : vector<16x32xf32>
    %9 = arith.mulf %8, %8 : vector<16x32xf32>
    %cst_6 = arith.constant dense<0.000000e+00> : vector<16xf32>
    %10 = vector.multi_reduction <add>, %9, %cst_6 [1] : vector<16x32xf32> to vector<16xf32>
    %11 = vector.shape_cast %10 : vector<16xf32> to vector<16x1xf32>
    %cst_7 = arith.constant 3.200000e+01 : f32
    %12 = vector.broadcast %cst_7 : f32 to vector<16x1xf32>
    %13 = arith.divf %11, %12 : vector<16x1xf32>
    %14 = vector.broadcast %6 : vector<16x1xf32> to vector<16x32xf32>
    %15 = arith.subf %0, %14 : vector<16x32xf32>
    %cst_8 = arith.constant 9.99999996E-13 : f32
    %16 = vector.broadcast %cst_8 : f32 to vector<16x1xf32>
    %17 = arith.addf %13, %16 : vector<16x1xf32>
    %18 = math.rsqrt %17 : vector<16x1xf32>
    %19 = vector.broadcast %18 : vector<16x1xf32> to vector<16x32xf32>
    %20 = arith.mulf %15, %19 : vector<16x32xf32>
    %21 = vector.broadcast %1 : vector<1x32xf32> to vector<16x32xf32>
    %22 = arith.mulf %20, %21 : vector<16x32xf32>
    %23 = vector.broadcast %2 : vector<1x32xf32> to vector<16x32xf32>
    %24 = arith.addf %22, %23 : vector<16x32xf32>
    %25 = vector.shape_cast %24 : vector<16x32xf32> to vector<2x8x32xf32>
    %c0_9 = arith.constant 0 : index
    %c0_10 = arith.constant 0 : index
    %c0_11 = arith.constant 0 : index
    %c0_12 = arith.constant 0 : index
    %26 = vector.load %arg19[%c0_9, %c0_10, %c0_11, %c0_12] : memref<3x2x8x32xf32, #tpu.memory_space<vmem>>, vector<1x2x8x32xf32>
    %27 = vector.shape_cast %26 : vector<1x2x8x32xf32> to vector<2x8x32xf32>
    %28 = vector.shape_cast %25 : vector<2x8x32xf32> to vector<1x2x8x32xf32>
    tpu.vector_store %arg19[%c0_9, %c0_10, %c0_11, %c0_12], %28 {strides = array<i32>} : memref<3x2x8x32xf32, #tpu.memory_space<vmem>>, vector<1x2x8x32xf32>,
    %c0_13 = arith.constant 0 : index
    %c0_14 = arith.constant 0 : index
    %29 = vector.load %arg1[%c0_13, %c0_14] : memref<2x8xf32, #tpu.memory_space<vmem>>, vector<2x8xf32>
    %cst_15 = arith.constant 1.000000e+00 : f32
    %30 = vector.broadcast %cst_15 : f32 to vector<2x8xf32>
    %31 = arith.subf %30, %29 : vector<2x8xf32>
    %cst_16 = arith.constant -1.000000e+04 : f32
    %32 = vector.broadcast %cst_16 : f32 to vector<2x8xf32>
    %33 = arith.mulf %31, %32 : vector<2x8xf32>
    %c0_17 = arith.constant 0 : index
    %c0_18 = arith.constant 0 : index
    %c0_19 = arith.constant 0 : index
    %34 = vector.load %arg4[%c0_17, %c0_18, %c0_19] : memref<2x32x96xf32, #tpu.memory_space<vmem>>, vector<1x32x96xf32>
    %35 = vector.shape_cast %34 : vector<1x32x96xf32> to vector<32x96xf32>
    %cst_20 = arith.constant dense<0.000000e+00> : vector<16x96xf32>
    %36 = tpu.matmul %24, %35, %cst_20 {dimension_numbers = #tpu.dot_dimension_numbers<[1], [0], [0], [1], [0, 0, 1, 1], [], []>} : vector<16x32xf32>, vector<32x96xf32>, vector<16x96xf32> -> vector<16x96xf32>
    %c0_21 = arith.constant 0 : index
    %c0_22 = arith.constant 0 : index
    %c0_23 = arith.constant 0 : index
    %37 = vector.load %arg5[%c0_21, %c0_22, %c0_23] : memref<2x1x96xf32, #tpu.memory_space<vmem>>, vector<1x1x96xf32>
    %38 = vector.shape_cast %37 : vector<1x1x96xf32> to vector<1x96xf32>
    %39 = vector.broadcast %38 : vector<1x96xf32> to vector<16x96xf32>
    %40 = arith.addf %36, %39 : vector<16x96xf32>
    %41 = vector.extract_strided_slice %33 {offsets = [0, 0], sizes = [1, 8], strides = [1, 1]} : vector<2x8xf32> to vector<1x8xf32>
    %42 = vector.extract_strided_slice %40 {offsets = [0, 0], sizes = [8, 16], strides = [1, 1]} : vector<16x96xf32> to vector<8x16xf32>
    %43 = vector.extract_strided_slice %40 {offsets = [0, 32], sizes = [8, 16], strides = [1, 1]} : vector<16x96xf32> to vector<8x16xf32>
    %44 = vector.extract_strided_slice %40 {offsets = [0, 64], sizes = [8, 16], strides = [1, 1]} : vector<16x96xf32> to vector<8x16xf32>
    %45 = tpu.transpose %43, [1, 0] : vector<8x16xf32> -> vector<16x8xf32>
    %cst_24 = arith.constant dense<0.000000e+00> : vector<8x8xf32>
    %46 = tpu.matmul %42, %45, %cst_24 {dimension_numbers = #tpu.dot_dimension_numbers<[1], [0], [0], [1], [0, 0, 1, 1], [], []>} : vector<8x16xf32>, vector<16x8xf32>, vector<8x8xf32> -> vector<8x8xf32>
    %cst_25 = arith.constant 2.500000e-01 : f32
    %47 = vector.broadcast %cst_25 : f32 to vector<8x8xf32>
    %48 = arith.mulf %46, %47 : vector<8x8xf32>
    %49 = vector.broadcast %41 : vector<1x8xf32> to vector<8x8xf32>
    %50 = arith.addf %48, %49 : vector<8x8xf32>
    %cst_26 = arith.constant dense<0xFF800000> : vector<8xf32>
    %51 = vector.multi_reduction <maximumf>, %50, %cst_26 [1] : vector<8x8xf32> to vector<8xf32>
    %52 = vector.shape_cast %51 : vector<8xf32> to vector<8x1xf32>
    %53 = vector.broadcast %52 : vector<8x1xf32> to vector<8x8xf32>
    %54 = arith.subf %50, %53 : vector<8x8xf32>
    %55 = math.exp %54 : vector<8x8xf32>
    %cst_27 = arith.constant dense<0.000000e+00> : vector<8xf32>
    %56 = vector.multi_reduction <add>, %55, %cst_27 [1] : vector<8x8xf32> to vector<8xf32>
    %57 = vector.shape_cast %56 : vector<8xf32> to vector<8x1xf32>
    %58 = tpu.reciprocal %57 {approx = true} : vector<8x1xf32> -> vector<8x1xf32>
    %59 = vector.broadcast %58 : vector<8x1xf32> to vector<8x8xf32>
    %60 = arith.mulf %55, %59 : vector<8x8xf32>
    %cst_28 = arith.constant dense<0.000000e+00> : vector<8x16xf32>
    %61 = tpu.matmul %60, %44, %cst_28 {dimension_numbers = #tpu.dot_dimension_numbers<[1], [0], [0], [1], [0, 0, 1, 1], [], []>} : vector<8x8xf32>, vector<8x16xf32>, vector<8x16xf32> -> vector<8x16xf32>
    %c0_29 = arith.constant 0 : index
    %c0_30 = arith.constant 0 : index
    %62 = vector.load %arg22[%c0_29, %c0_30] : memref<16x32xf32, #tpu.memory_space<vmem>>, vector<8x16xf32>
    tpu.vector_store %arg22[%c0_29, %c0_30], %61 {strides = array<i32>} : memref<16x32xf32, #tpu.memory_space<vmem>>, vector<8x16xf32>,
    %63 = vector.extract_strided_slice %40 {offsets = [0, 16], sizes = [8, 16], strides = [1, 1]} : vector<16x96xf32> to vector<8x16xf32>
    %64 = vector.extract_strided_slice %40 {offsets = [0, 48], sizes = [8, 16], strides = [1, 1]} : vector<16x96xf32> to vector<8x16xf32>
    %65 = vector.extract_strided_slice %40 {offsets = [0, 80], sizes = [8, 16], strides = [1, 1]} : vector<16x96xf32> to vector<8x16xf32>
    %66 = tpu.transpose %64, [1, 0] : vector<8x16xf32> -> vector<16x8xf32>
    %cst_31 = arith.constant dense<0.000000e+00> : vector<8x8xf32>
    %67 = tpu.matmul %63, %66, %cst_31 {dimension_numbers = #tpu.dot_dimension_numbers<[1], [0], [0], [1], [0, 0, 1, 1], [], []>} : vector<8x16xf32>, vector<16x8xf32>, vector<8x8xf32> -> vector<8x8xf32>
    %cst_32 = arith.constant 2.500000e-01 : f32
    %68 = vector.broadcast %cst_32 : f32 to vector<8x8xf32>
    %69 = arith.mulf %67, %68 : vector<8x8xf32>
    %70 = vector.broadcast %41 : vector<1x8xf32> to vector<8x8xf32>
    %71 = arith.addf %69, %70 : vector<8x8xf32>
    %cst_33 = arith.constant dense<0xFF800000> : vector<8xf32>
    %72 = vector.multi_reduction <maximumf>, %71, %cst_33 [1] : vector<8x8xf32> to vector<8xf32>
    %73 = vector.shape_cast %72 : vector<8xf32> to vector<8x1xf32>
    %74 = vector.broadcast %73 : vector<8x1xf32> to vector<8x8xf32>
    %75 = arith.subf %71, %74 : vector<8x8xf32>
    %76 = math.exp %75 : vector<8x8xf32>
    %cst_34 = arith.constant dense<0.000000e+00> : vector<8xf32>
    %77 = vector.multi_reduction <add>, %76, %cst_34 [1] : vector<8x8xf32> to vector<8xf32>
    %78 = vector.shape_cast %77 : vector<8xf32> to vector<8x1xf32>
    %79 = tpu.reciprocal %78 {approx = true} : vector<8x1xf32> -> vector<8x1xf32>
    %80 = vector.broadcast %79 : vector<8x1xf32> to vector<8x8xf32>
    %81 = arith.mulf %76, %80 : vector<8x8xf32>
    %cst_35 = arith.constant dense<0.000000e+00> : vector<8x16xf32>
    %82 = tpu.matmul %81, %65, %cst_35 {dimension_numbers = #tpu.dot_dimension_numbers<[1], [0], [0], [1], [0, 0, 1, 1], [], []>} : vector<8x8xf32>, vector<8x16xf32>, vector<8x16xf32> -> vector<8x16xf32>
    %c0_36 = arith.constant 0 : index
    %c16 = arith.constant 16 : index
    %83 = vector.load %arg22[%c0_36, %c16] : memref<16x32xf32, #tpu.memory_space<vmem>>, vector<8x16xf32>
    tpu.vector_store %arg22[%c0_36, %c16], %82 {strides = array<i32>} : memref<16x32xf32, #tpu.memory_space<vmem>>, vector<8x16xf32>,
    %84 = vector.extract_strided_slice %33 {offsets = [1, 0], sizes = [1, 8], strides = [1, 1]} : vector<2x8xf32> to vector<1x8xf32>
    %85 = vector.extract_strided_slice %40 {offsets = [8, 0], sizes = [8, 16], strides = [1, 1]} : vector<16x96xf32> to vector<8x16xf32>
    %86 = vector.extract_strided_slice %40 {offsets = [8, 32], sizes = [8, 16], strides = [1, 1]} : vector<16x96xf32> to vector<8x16xf32>
    %87 = vector.extract_strided_slice %40 {offsets = [8, 64], sizes = [8, 16], strides = [1, 1]} : vector<16x96xf32> to vector<8x16xf32>
    %88 = tpu.transpose %86, [1, 0] : vector<8x16xf32> -> vector<16x8xf32>
    %cst_37 = arith.constant dense<0.000000e+00> : vector<8x8xf32>
    %89 = tpu.matmul %85, %88, %cst_37 {dimension_numbers = #tpu.dot_dimension_numbers<[1], [0], [0], [1], [0, 0, 1, 1], [], []>} : vector<8x16xf32>, vector<16x8xf32>, vector<8x8xf32> -> vector<8x8xf32>
    %cst_38 = arith.constant 2.500000e-01 : f32
    %90 = vector.broadcast %cst_38 : f32 to vector<8x8xf32>
    %91 = arith.mulf %89, %90 : vector<8x8xf32>
    %92 = vector.broadcast %84 : vector<1x8xf32> to vector<8x8xf32>
    %93 = arith.addf %91, %92 : vector<8x8xf32>
    %cst_39 = arith.constant dense<0xFF800000> : vector<8xf32>
    %94 = vector.multi_reduction <maximumf>, %93, %cst_39 [1] : vector<8x8xf32> to vector<8xf32>
    %95 = vector.shape_cast %94 : vector<8xf32> to vector<8x1xf32>
    %96 = vector.broadcast %95 : vector<8x1xf32> to vector<8x8xf32>
    %97 = arith.subf %93, %96 : vector<8x8xf32>
    %98 = math.exp %97 : vector<8x8xf32>
    %cst_40 = arith.constant dense<0.000000e+00> : vector<8xf32>
    %99 = vector.multi_reduction <add>, %98, %cst_40 [1] : vector<8x8xf32> to vector<8xf32>
    %100 = vector.shape_cast %99 : vector<8xf32> to vector<8x1xf32>
    %101 = tpu.reciprocal %100 {approx = true} : vector<8x1xf32> -> vector<8x1xf32>
    %102 = vector.broadcast %101 : vector<8x1xf32> to vector<8x8xf32>
    %103 = arith.mulf %98, %102 : vector<8x8xf32>
    %cst_41 = arith.constant dense<0.000000e+00> : vector<8x16xf32>
    %104 = tpu.matmul %103, %87, %cst_41 {dimension_numbers = #tpu.dot_dimension_numbers<[1], [0], [0], [1], [0, 0, 1, 1], [], []>} : vector<8x8xf32>, vector<8x16xf32>, vector<8x16xf32> -> vector<8x16xf32>
    %c8 = arith.constant 8 : index
    %c0_42 = arith.constant 0 : index
    %105 = vector.load %arg22[%c8, %c0_42] : memref<16x32xf32, #tpu.memory_space<vmem>>, vector<8x16xf32>
    tpu.vector_store %arg22[%c8, %c0_42], %104 {strides = array<i32>} : memref<16x32xf32, #tpu.memory_space<vmem>>, vector<8x16xf32>,
    %106 = vector.extract_strided_slice %40 {offsets = [8, 16], sizes = [8, 16], strides = [1, 1]} : vector<16x96xf32> to vector<8x16xf32>
    %107 = vector.extract_strided_slice %40 {offsets = [8, 48], sizes = [8, 16], strides = [1, 1]} : vector<16x96xf32> to vector<8x16xf32>
    %108 = vector.extract_strided_slice %40 {offsets = [8, 80], sizes = [8, 16], strides = [1, 1]} : vector<16x96xf32> to vector<8x16xf32>
    %109 = tpu.transpose %107, [1, 0] : vector<8x16xf32> -> vector<16x8xf32>
    %cst_43 = arith.constant dense<0.000000e+00> : vector<8x8xf32>
    %110 = tpu.matmul %106, %109, %cst_43 {dimension_numbers = #tpu.dot_dimension_numbers<[1], [0], [0], [1], [0, 0, 1, 1], [], []>} : vector<8x16xf32>, vector<16x8xf32>, vector<8x8xf32> -> vector<8x8xf32>
    %cst_44 = arith.constant 2.500000e-01 : f32
    %111 = vector.broadcast %cst_44 : f32 to vector<8x8xf32>
    %112 = arith.mulf %110, %111 : vector<8x8xf32>
    %113 = vector.broadcast %84 : vector<1x8xf32> to vector<8x8xf32>
    %114 = arith.addf %112, %113 : vector<8x8xf32>
    %cst_45 = arith.constant dense<0xFF800000> : vector<8xf32>
    %115 = vector.multi_reduction <maximumf>, %114, %cst_45 [1] : vector<8x8xf32> to vector<8xf32>
    %116 = vector.shape_cast %115 : vector<8xf32> to vector<8x1xf32>
    %117 = vector.broadcast %116 : vector<8x1xf32> to vector<8x8xf32>
    %118 = arith.subf %114, %117 : vector<8x8xf32>
    %119 = math.exp %118 : vector<8x8xf32>
    %cst_46 = arith.constant dense<0.000000e+00> : vector<8xf32>
    %120 = vector.multi_reduction <add>, %119, %cst_46 [1] : vector<8x8xf32> to vector<8xf32>
    %121 = vector.shape_cast %120 : vector<8xf32> to vector<8x1xf32>
    %122 = tpu.reciprocal %121 {approx = true} : vector<8x1xf32> -> vector<8x1xf32>
    %123 = vector.broadcast %122 : vector<8x1xf32> to vector<8x8xf32>
    %124 = arith.mulf %119, %123 : vector<8x8xf32>
    %cst_47 = arith.constant dense<0.000000e+00> : vector<8x16xf32>
    %125 = tpu.matmul %124, %108, %cst_47 {dimension_numbers = #tpu.dot_dimension_numbers<[1], [0], [0], [1], [0, 0, 1, 1], [], []>} : vector<8x8xf32>, vector<8x16xf32>, vector<8x16xf32> -> vector<8x16xf32>
    %c8_48 = arith.constant 8 : index
    %c16_49 = arith.constant 16 : index
    %126 = vector.load %arg22[%c8_48, %c16_49] : memref<16x32xf32, #tpu.memory_space<vmem>>, vector<8x16xf32>
    tpu.vector_store %arg22[%c8_48, %c16_49], %125 {strides = array<i32>} : memref<16x32xf32, #tpu.memory_space<vmem>>, vector<8x16xf32>,
    %c0_50 = arith.constant 0 : index
    %c0_51 = arith.constant 0 : index
    %127 = vector.load %arg22[%c0_50, %c0_51] : memref<16x32xf32, #tpu.memory_space<vmem>>, vector<16x32xf32>
    %c0_52 = arith.constant 0 : index
    %c0_53 = arith.constant 0 : index
    %c0_54 = arith.constant 0 : index
    %128 = vector.load %arg6[%c0_52, %c0_53, %c0_54] : memref<2x32x32xf32, #tpu.memory_space<vmem>>, vector<1x32x32xf32>
    %129 = vector.shape_cast %128 : vector<1x32x32xf32> to vector<32x32xf32>
    %cst_55 = arith.constant dense<0.000000e+00> : vector<16x32xf32>
    %130 = tpu.matmul %127, %129, %cst_55 {dimension_numbers = #tpu.dot_dimension_numbers<[1], [0], [0], [1], [0, 0, 1, 1], [], []>} : vector<16x32xf32>, vector<32x32xf32>, vector<16x32xf32> -> vector<16x32xf32>
    %c0_56 = arith.constant 0 : index
    %c0_57 = arith.constant 0 : index
    %c0_58 = arith.constant 0 : index
    %131 = vector.load %arg7[%c0_56, %c0_57, %c0_58] : memref<2x1x32xf32, #tpu.memory_space<vmem>>, vector<1x1x32xf32>
    %132 = vector.shape_cast %131 : vector<1x1x32xf32> to vector<1x32xf32>
    %133 = vector.broadcast %132 : vector<1x32xf32> to vector<16x32xf32>
    %134 = arith.addf %130, %133 : vector<16x32xf32>
    %135 = arith.addf %24, %134 : vector<16x32xf32>
    %c0_59 = arith.constant 0 : index
    %c0_60 = arith.constant 0 : index
    %c0_61 = arith.constant 0 : index
    %136 = vector.load %arg8[%c0_59, %c0_60, %c0_61] : memref<2x1x32xf32, #tpu.memory_space<vmem>>, vector<1x1x32xf32>
    %137 = vector.shape_cast %136 : vector<1x1x32xf32> to vector<1x32xf32>
    %c0_62 = arith.constant 0 : index
    %c0_63 = arith.constant 0 : index
    %c0_64 = arith.constant 0 : index
    %138 = vector.load %arg9[%c0_62, %c0_63, %c0_64] : memref<2x1x32xf32, #tpu.memory_space<vmem>>, vector<1x1x32xf32>
    %139 = vector.shape_cast %138 : vector<1x1x32xf32> to vector<1x32xf32>
    %cst_65 = arith.constant dense<0.000000e+00> : vector<16xf32>
    %140 = vector.multi_reduction <add>, %135, %cst_65 [1] : vector<16x32xf32> to vector<16xf32>
    %141 = vector.shape_cast %140 : vector<16xf32> to vector<16x1xf32>
    %cst_66 = arith.constant 3.200000e+01 : f32
    %142 = vector.broadcast %cst_66 : f32 to vector<16x1xf32>
    %143 = arith.divf %141, %142 : vector<16x1xf32>
    %144 = vector.broadcast %143 : vector<16x1xf32> to vector<16x32xf32>
    %145 = arith.subf %135, %144 : vector<16x32xf32>
    %146 = arith.mulf %145, %145 : vector<16x32xf32>
    %cst_67 = arith.constant dense<0.000000e+00> : vector<16xf32>
    %147 = vector.multi_reduction <add>, %146, %cst_67 [1] : vector<16x32xf32> to vector<16xf32>
    %148 = vector.shape_cast %147 : vector<16xf32> to vector<16x1xf32>
    %cst_68 = arith.constant 3.200000e+01 : f32
    %149 = vector.broadcast %cst_68 : f32 to vector<16x1xf32>
    %150 = arith.divf %148, %149 : vector<16x1xf32>
    %151 = vector.broadcast %143 : vector<16x1xf32> to vector<16x32xf32>
    %152 = arith.subf %135, %151 : vector<16x32xf32>
    %cst_69 = arith.constant 9.99999996E-13 : f32
    %153 = vector.broadcast %cst_69 : f32 to vector<16x1xf32>
    %154 = arith.addf %150, %153 : vector<16x1xf32>
    %155 = math.rsqrt %154 : vector<16x1xf32>
    %156 = vector.broadcast %155 : vector<16x1xf32> to vector<16x32xf32>
    %157 = arith.mulf %152, %156 : vector<16x32xf32>
    %158 = vector.broadcast %137 : vector<1x32xf32> to vector<16x32xf32>
    %159 = arith.mulf %157, %158 : vector<16x32xf32>
    %160 = vector.broadcast %139 : vector<1x32xf32> to vector<16x32xf32>
    %161 = arith.addf %159, %160 : vector<16x32xf32>
    %c0_70 = arith.constant 0 : index
    %c0_71 = arith.constant 0 : index
    %c0_72 = arith.constant 0 : index
    %162 = vector.load %arg10[%c0_70, %c0_71, %c0_72] : memref<2x32x64xf32, #tpu.memory_space<vmem>>, vector<1x32x64xf32>
    %163 = vector.shape_cast %162 : vector<1x32x64xf32> to vector<32x64xf32>
    %cst_73 = arith.constant dense<0.000000e+00> : vector<16x64xf32>
    %164 = tpu.matmul %161, %163, %cst_73 {dimension_numbers = #tpu.dot_dimension_numbers<[1], [0], [0], [1], [0, 0, 1, 1], [], []>} : vector<16x32xf32>, vector<32x64xf32>, vector<16x64xf32> -> vector<16x64xf32>
    %c0_74 = arith.constant 0 : index
    %c0_75 = arith.constant 0 : index
    %c0_76 = arith.constant 0 : index
    %165 = vector.load %arg11[%c0_74, %c0_75, %c0_76] : memref<2x1x64xf32, #tpu.memory_space<vmem>>, vector<1x1x64xf32>
    %166 = vector.shape_cast %165 : vector<1x1x64xf32> to vector<1x64xf32>
    %167 = vector.broadcast %166 : vector<1x64xf32> to vector<16x64xf32>
    %168 = arith.addf %164, %167 : vector<16x64xf32>
    %169 = arith.mulf %168, %168 : vector<16x64xf32>
    %170 = arith.mulf %168, %169 : vector<16x64xf32>
    %cst_77 = arith.constant 4.471500e-02 : f32
    %171 = vector.broadcast %cst_77 : f32 to vector<16x64xf32>
    %172 = arith.mulf %171, %170 : vector<16x64xf32>
    %173 = arith.addf %168, %172 : vector<16x64xf32>
    %cst_78 = arith.constant 0.797884583 : f32
    %174 = vector.broadcast %cst_78 : f32 to vector<16x64xf32>
    %175 = arith.mulf %174, %173 : vector<16x64xf32>
    %176 = math.tanh %175 : vector<16x64xf32>
    %cst_79 = arith.constant 1.000000e+00 : f32
    %177 = vector.broadcast %cst_79 : f32 to vector<16x64xf32>
    %178 = arith.addf %177, %176 : vector<16x64xf32>
    %cst_80 = arith.constant 5.000000e-01 : f32
    %179 = vector.broadcast %cst_80 : f32 to vector<16x64xf32>
    %180 = arith.mulf %179, %178 : vector<16x64xf32>
    %181 = arith.mulf %168, %180 : vector<16x64xf32>
    %c0_81 = arith.constant 0 : index
    %c0_82 = arith.constant 0 : index
    %c0_83 = arith.constant 0 : index
    %182 = vector.load %arg12[%c0_81, %c0_82, %c0_83] : memref<2x64x32xf32, #tpu.memory_space<vmem>>, vector<1x64x32xf32>
    %183 = vector.shape_cast %182 : vector<1x64x32xf32> to vector<64x32xf32>
    %cst_84 = arith.constant dense<0.000000e+00> : vector<16x32xf32>
    %184 = tpu.matmul %181, %183, %cst_84 {dimension_numbers = #tpu.dot_dimension_numbers<[1], [0], [0], [1], [0, 0, 1, 1], [], []>} : vector<16x64xf32>, vector<64x32xf32>, vector<16x32xf32> -> vector<16x32xf32>
    %c0_85 = arith.constant 0 : index
    %c0_86 = arith.constant 0 : index
    %c0_87 = arith.constant 0 : index
    %185 = vector.load %arg13[%c0_85, %c0_86, %c0_87] : memref<2x1x32xf32, #tpu.memory_space<vmem>>, vector<1x1x32xf32>
    %186 = vector.shape_cast %185 : vector<1x1x32xf32> to vector<1x32xf32>
    %187 = vector.broadcast %186 : vector<1x32xf32> to vector<16x32xf32>
    %188 = arith.addf %184, %187 : vector<16x32xf32>
    %189 = arith.addf %161, %188 : vector<16x32xf32>
    %c0_88 = arith.constant 0 : index
    %c0_89 = arith.constant 0 : index
    %c0_90 = arith.constant 0 : index
    %190 = vector.load %arg14[%c0_88, %c0_89, %c0_90] : memref<2x1x32xf32, #tpu.memory_space<vmem>>, vector<1x1x32xf32>
    %191 = vector.shape_cast %190 : vector<1x1x32xf32> to vector<1x32xf32>
    %c0_91 = arith.constant 0 : index
    %c0_92 = arith.constant 0 : index
    %c0_93 = arith.constant 0 : index
    %192 = vector.load %arg15[%c0_91, %c0_92, %c0_93] : memref<2x1x32xf32, #tpu.memory_space<vmem>>, vector<1x1x32xf32>
    %193 = vector.shape_cast %192 : vector<1x1x32xf32> to vector<1x32xf32>
    %cst_94 = arith.constant dense<0.000000e+00> : vector<16xf32>
    %194 = vector.multi_reduction <add>, %189, %cst_94 [1] : vector<16x32xf32> to vector<16xf32>
    %195 = vector.shape_cast %194 : vector<16xf32> to vector<16x1xf32>
    %cst_95 = arith.constant 3.200000e+01 : f32
    %196 = vector.broadcast %cst_95 : f32 to vector<16x1xf32>
    %197 = arith.divf %195, %196 : vector<16x1xf32>
    %198 = vector.broadcast %197 : vector<16x1xf32> to vector<16x32xf32>
    %199 = arith.subf %189, %198 : vector<16x32xf32>
    %200 = arith.mulf %199, %199 : vector<16x32xf32>
    %cst_96 = arith.constant dense<0.000000e+00> : vector<16xf32>
    %201 = vector.multi_reduction <add>, %200, %cst_96 [1] : vector<16x32xf32> to vector<16xf32>
    %202 = vector.shape_cast %201 : vector<16xf32> to vector<16x1xf32>
    %cst_97 = arith.constant 3.200000e+01 : f32
    %203 = vector.broadcast %cst_97 : f32 to vector<16x1xf32>
    %204 = arith.divf %202, %203 : vector<16x1xf32>
    %205 = vector.broadcast %197 : vector<16x1xf32> to vector<16x32xf32>
    %206 = arith.subf %189, %205 : vector<16x32xf32>
    %cst_98 = arith.constant 9.99999996E-13 : f32
    %207 = vector.broadcast %cst_98 : f32 to vector<16x1xf32>
    %208 = arith.addf %204, %207 : vector<16x1xf32>
    %209 = math.rsqrt %208 : vector<16x1xf32>
    %210 = vector.broadcast %209 : vector<16x1xf32> to vector<16x32xf32>
    %211 = arith.mulf %206, %210 : vector<16x32xf32>
    %212 = vector.broadcast %191 : vector<1x32xf32> to vector<16x32xf32>
    %213 = arith.mulf %211, %212 : vector<16x32xf32>
    %214 = vector.broadcast %193 : vector<1x32xf32> to vector<16x32xf32>
    %215 = arith.addf %213, %214 : vector<16x32xf32>
    %216 = vector.shape_cast %215 : vector<16x32xf32> to vector<2x8x32xf32>
    %c1 = arith.constant 1 : index
    %c0_99 = arith.constant 0 : index
    %c0_100 = arith.constant 0 : index
    %c0_101 = arith.constant 0 : index
    %217 = vector.load %arg19[%c1, %c0_99, %c0_100, %c0_101] : memref<3x2x8x32xf32, #tpu.memory_space<vmem>>, vector<1x2x8x32xf32>
    %218 = vector.shape_cast %217 : vector<1x2x8x32xf32> to vector<2x8x32xf32>
    %219 = vector.shape_cast %216 : vector<2x8x32xf32> to vector<1x2x8x32xf32>
    tpu.vector_store %arg19[%c1, %c0_99, %c0_100, %c0_101], %219 {strides = array<i32>} : memref<3x2x8x32xf32, #tpu.memory_space<vmem>>, vector<1x2x8x32xf32>,
    %c1_102 = arith.constant 1 : index
    %c0_103 = arith.constant 0 : index
    %c0_104 = arith.constant 0 : index
    %220 = vector.load %arg4[%c1_102, %c0_103, %c0_104] : memref<2x32x96xf32, #tpu.memory_space<vmem>>, vector<1x32x96xf32>
    %221 = vector.shape_cast %220 : vector<1x32x96xf32> to vector<32x96xf32>
    %cst_105 = arith.constant dense<0.000000e+00> : vector<16x96xf32>
    %222 = tpu.matmul %215, %221, %cst_105 {dimension_numbers = #tpu.dot_dimension_numbers<[1], [0], [0], [1], [0, 0, 1, 1], [], []>} : vector<16x32xf32>, vector<32x96xf32>, vector<16x96xf32> -> vector<16x96xf32>
    %c1_106 = arith.constant 1 : index
    %c0_107 = arith.constant 0 : index
    %c0_108 = arith.constant 0 : index
    %223 = vector.load %arg5[%c1_106, %c0_107, %c0_108] : memref<2x1x96xf32, #tpu.memory_space<vmem>>, vector<1x1x96xf32>
    %224 = vector.shape_cast %223 : vector<1x1x96xf32> to vector<1x96xf32>
    %225 = vector.broadcast %224 : vector<1x96xf32> to vector<16x96xf32>
    %226 = arith.addf %222, %225 : vector<16x96xf32>
    %227 = vector.extract_strided_slice %33 {offsets = [0, 0], sizes = [1, 8], strides = [1, 1]} : vector<2x8xf32> to vector<1x8xf32>
    %228 = vector.extract_strided_slice %226 {offsets = [0, 0], sizes = [8, 16], strides = [1, 1]} : vector<16x96xf32> to vector<8x16xf32>
    %229 = vector.extract_strided_slice %226 {offsets = [0, 32], sizes = [8, 16], strides = [1, 1]} : vector<16x96xf32> to vector<8x16xf32>
    %230 = vector.extract_strided_slice %226 {offsets = [0, 64], sizes = [8, 16], strides = [1, 1]} : vector<16x96xf32> to vector<8x16xf32>
    %231 = tpu.transpose %229, [1, 0] : vector<8x16xf32> -> vector<16x8xf32>
    %cst_109 = arith.constant dense<0.000000e+00> : vector<8x8xf32>
    %232 = tpu.matmul %228, %231, %cst_109 {dimension_numbers = #tpu.dot_dimension_numbers<[1], [0], [0], [1], [0, 0, 1, 1], [], []>} : vector<8x16xf32>, vector<16x8xf32>, vector<8x8xf32> -> vector<8x8xf32>
    %cst_110 = arith.constant 2.500000e-01 : f32
    %233 = vector.broadcast %cst_110 : f32 to vector<8x8xf32>
    %234 = arith.mulf %232, %233 : vector<8x8xf32>
    %235 = vector.broadcast %227 : vector<1x8xf32> to vector<8x8xf32>
    %236 = arith.addf %234, %235 : vector<8x8xf32>
    %cst_111 = arith.constant dense<0xFF800000> : vector<8xf32>
    %237 = vector.multi_reduction <maximumf>, %236, %cst_111 [1] : vector<8x8xf32> to vector<8xf32>
    %238 = vector.shape_cast %237 : vector<8xf32> to vector<8x1xf32>
    %239 = vector.broadcast %238 : vector<8x1xf32> to vector<8x8xf32>
    %240 = arith.subf %236, %239 : vector<8x8xf32>
    %241 = math.exp %240 : vector<8x8xf32>
    %cst_112 = arith.constant dense<0.000000e+00> : vector<8xf32>
    %242 = vector.multi_reduction <add>, %241, %cst_112 [1] : vector<8x8xf32> to vector<8xf32>
    %243 = vector.shape_cast %242 : vector<8xf32> to vector<8x1xf32>
    %244 = tpu.reciprocal %243 {approx = true} : vector<8x1xf32> -> vector<8x1xf32>
    %245 = vector.broadcast %244 : vector<8x1xf32> to vector<8x8xf32>
    %246 = arith.mulf %241, %245 : vector<8x8xf32>
    %cst_113 = arith.constant dense<0.000000e+00> : vector<8x16xf32>
    %247 = tpu.matmul %246, %230, %cst_113 {dimension_numbers = #tpu.dot_dimension_numbers<[1], [0], [0], [1], [0, 0, 1, 1], [], []>} : vector<8x8xf32>, vector<8x16xf32>, vector<8x16xf32> -> vector<8x16xf32>
    %c0_114 = arith.constant 0 : index
    %c0_115 = arith.constant 0 : index
    %248 = vector.load %arg22[%c0_114, %c0_115] : memref<16x32xf32, #tpu.memory_space<vmem>>, vector<8x16xf32>
    tpu.vector_store %arg22[%c0_114, %c0_115], %247 {strides = array<i32>} : memref<16x32xf32, #tpu.memory_space<vmem>>, vector<8x16xf32>,
    %249 = vector.extract_strided_slice %226 {offsets = [0, 16], sizes = [8, 16], strides = [1, 1]} : vector<16x96xf32> to vector<8x16xf32>
    %250 = vector.extract_strided_slice %226 {offsets = [0, 48], sizes = [8, 16], strides = [1, 1]} : vector<16x96xf32> to vector<8x16xf32>
    %251 = vector.extract_strided_slice %226 {offsets = [0, 80], sizes = [8, 16], strides = [1, 1]} : vector<16x96xf32> to vector<8x16xf32>
    %252 = tpu.transpose %250, [1, 0] : vector<8x16xf32> -> vector<16x8xf32>
    %cst_116 = arith.constant dense<0.000000e+00> : vector<8x8xf32>
    %253 = tpu.matmul %249, %252, %cst_116 {dimension_numbers = #tpu.dot_dimension_numbers<[1], [0], [0], [1], [0, 0, 1, 1], [], []>} : vector<8x16xf32>, vector<16x8xf32>, vector<8x8xf32> -> vector<8x8xf32>
    %cst_117 = arith.constant 2.500000e-01 : f32
    %254 = vector.broadcast %cst_117 : f32 to vector<8x8xf32>
    %255 = arith.mulf %253, %254 : vector<8x8xf32>
    %256 = vector.broadcast %227 : vector<1x8xf32> to vector<8x8xf32>
    %257 = arith.addf %255, %256 : vector<8x8xf32>
    %cst_118 = arith.constant dense<0xFF800000> : vector<8xf32>
    %258 = vector.multi_reduction <maximumf>, %257, %cst_118 [1] : vector<8x8xf32> to vector<8xf32>
    %259 = vector.shape_cast %258 : vector<8xf32> to vector<8x1xf32>
    %260 = vector.broadcast %259 : vector<8x1xf32> to vector<8x8xf32>
    %261 = arith.subf %257, %260 : vector<8x8xf32>
    %262 = math.exp %261 : vector<8x8xf32>
    %cst_119 = arith.constant dense<0.000000e+00> : vector<8xf32>
    %263 = vector.multi_reduction <add>, %262, %cst_119 [1] : vector<8x8xf32> to vector<8xf32>
    %264 = vector.shape_cast %263 : vector<8xf32> to vector<8x1xf32>
    %265 = tpu.reciprocal %264 {approx = true} : vector<8x1xf32> -> vector<8x1xf32>
    %266 = vector.broadcast %265 : vector<8x1xf32> to vector<8x8xf32>
    %267 = arith.mulf %262, %266 : vector<8x8xf32>
    %cst_120 = arith.constant dense<0.000000e+00> : vector<8x16xf32>
    %268 = tpu.matmul %267, %251, %cst_120 {dimension_numbers = #tpu.dot_dimension_numbers<[1], [0], [0], [1], [0, 0, 1, 1], [], []>} : vector<8x8xf32>, vector<8x16xf32>, vector<8x16xf32> -> vector<8x16xf32>
    %c0_121 = arith.constant 0 : index
    %c16_122 = arith.constant 16 : index
    %269 = vector.load %arg22[%c0_121, %c16_122] : memref<16x32xf32, #tpu.memory_space<vmem>>, vector<8x16xf32>
    tpu.vector_store %arg22[%c0_121, %c16_122], %268 {strides = array<i32>} : memref<16x32xf32, #tpu.memory_space<vmem>>, vector<8x16xf32>,
    %270 = vector.extract_strided_slice %33 {offsets = [1, 0], sizes = [1, 8], strides = [1, 1]} : vector<2x8xf32> to vector<1x8xf32>
    %271 = vector.extract_strided_slice %226 {offsets = [8, 0], sizes = [8, 16], strides = [1, 1]} : vector<16x96xf32> to vector<8x16xf32>
    %272 = vector.extract_strided_slice %226 {offsets = [8, 32], sizes = [8, 16], strides = [1, 1]} : vector<16x96xf32> to vector<8x16xf32>
    %273 = vector.extract_strided_slice %226 {offsets = [8, 64], sizes = [8, 16], strides = [1, 1]} : vector<16x96xf32> to vector<8x16xf32>
    %274 = tpu.transpose %272, [1, 0] : vector<8x16xf32> -> vector<16x8xf32>
    %cst_123 = arith.constant dense<0.000000e+00> : vector<8x8xf32>
    %275 = tpu.matmul %271, %274, %cst_123 {dimension_numbers = #tpu.dot_dimension_numbers<[1], [0], [0], [1], [0, 0, 1, 1], [], []>} : vector<8x16xf32>, vector<16x8xf32>, vector<8x8xf32> -> vector<8x8xf32>
    %cst_124 = arith.constant 2.500000e-01 : f32
    %276 = vector.broadcast %cst_124 : f32 to vector<8x8xf32>
    %277 = arith.mulf %275, %276 : vector<8x8xf32>
    %278 = vector.broadcast %270 : vector<1x8xf32> to vector<8x8xf32>
    %279 = arith.addf %277, %278 : vector<8x8xf32>
    %cst_125 = arith.constant dense<0xFF800000> : vector<8xf32>
    %280 = vector.multi_reduction <maximumf>, %279, %cst_125 [1] : vector<8x8xf32> to vector<8xf32>
    %281 = vector.shape_cast %280 : vector<8xf32> to vector<8x1xf32>
    %282 = vector.broadcast %281 : vector<8x1xf32> to vector<8x8xf32>
    %283 = arith.subf %279, %282 : vector<8x8xf32>
    %284 = math.exp %283 : vector<8x8xf32>
    %cst_126 = arith.constant dense<0.000000e+00> : vector<8xf32>
    %285 = vector.multi_reduction <add>, %284, %cst_126 [1] : vector<8x8xf32> to vector<8xf32>
    %286 = vector.shape_cast %285 : vector<8xf32> to vector<8x1xf32>
    %287 = tpu.reciprocal %286 {approx = true} : vector<8x1xf32> -> vector<8x1xf32>
    %288 = vector.broadcast %287 : vector<8x1xf32> to vector<8x8xf32>
    %289 = arith.mulf %284, %288 : vector<8x8xf32>
    %cst_127 = arith.constant dense<0.000000e+00> : vector<8x16xf32>
    %290 = tpu.matmul %289, %273, %cst_127 {dimension_numbers = #tpu.dot_dimension_numbers<[1], [0], [0], [1], [0, 0, 1, 1], [], []>} : vector<8x8xf32>, vector<8x16xf32>, vector<8x16xf32> -> vector<8x16xf32>
    %c8_128 = arith.constant 8 : index
    %c0_129 = arith.constant 0 : index
    %291 = vector.load %arg22[%c8_128, %c0_129] : memref<16x32xf32, #tpu.memory_space<vmem>>, vector<8x16xf32>
    tpu.vector_store %arg22[%c8_128, %c0_129], %290 {strides = array<i32>} : memref<16x32xf32, #tpu.memory_space<vmem>>, vector<8x16xf32>,
    %292 = vector.extract_strided_slice %226 {offsets = [8, 16], sizes = [8, 16], strides = [1, 1]} : vector<16x96xf32> to vector<8x16xf32>
    %293 = vector.extract_strided_slice %226 {offsets = [8, 48], sizes = [8, 16], strides = [1, 1]} : vector<16x96xf32> to vector<8x16xf32>
    %294 = vector.extract_strided_slice %226 {offsets = [8, 80], sizes = [8, 16], strides = [1, 1]} : vector<16x96xf32> to vector<8x16xf32>
    %295 = tpu.transpose %293, [1, 0] : vector<8x16xf32> -> vector<16x8xf32>
    %cst_130 = arith.constant dense<0.000000e+00> : vector<8x8xf32>
    %296 = tpu.matmul %292, %295, %cst_130 {dimension_numbers = #tpu.dot_dimension_numbers<[1], [0], [0], [1], [0, 0, 1, 1], [], []>} : vector<8x16xf32>, vector<16x8xf32>, vector<8x8xf32> -> vector<8x8xf32>
    %cst_131 = arith.constant 2.500000e-01 : f32
    %297 = vector.broadcast %cst_131 : f32 to vector<8x8xf32>
    %298 = arith.mulf %296, %297 : vector<8x8xf32>
    %299 = vector.broadcast %270 : vector<1x8xf32> to vector<8x8xf32>
    %300 = arith.addf %298, %299 : vector<8x8xf32>
    %cst_132 = arith.constant dense<0xFF800000> : vector<8xf32>
    %301 = vector.multi_reduction <maximumf>, %300, %cst_132 [1] : vector<8x8xf32> to vector<8xf32>
    %302 = vector.shape_cast %301 : vector<8xf32> to vector<8x1xf32>
    %303 = vector.broadcast %302 : vector<8x1xf32> to vector<8x8xf32>
    %304 = arith.subf %300, %303 : vector<8x8xf32>
    %305 = math.exp %304 : vector<8x8xf32>
    %cst_133 = arith.constant dense<0.000000e+00> : vector<8xf32>
    %306 = vector.multi_reduction <add>, %305, %cst_133 [1] : vector<8x8xf32> to vector<8xf32>
    %307 = vector.shape_cast %306 : vector<8xf32> to vector<8x1xf32>
    %308 = tpu.reciprocal %307 {approx = true} : vector<8x1xf32> -> vector<8x1xf32>
    %309 = vector.broadcast %308 : vector<8x1xf32> to vector<8x8xf32>
    %310 = arith.mulf %305, %309 : vector<8x8xf32>
    %cst_134 = arith.constant dense<0.000000e+00> : vector<8x16xf32>
    %311 = tpu.matmul %310, %294, %cst_134 {dimension_numbers = #tpu.dot_dimension_numbers<[1], [0], [0], [1], [0, 0, 1, 1], [], []>} : vector<8x8xf32>, vector<8x16xf32>, vector<8x16xf32> -> vector<8x16xf32>
    %c8_135 = arith.constant 8 : index
    %c16_136 = arith.constant 16 : index
    %312 = vector.load %arg22[%c8_135, %c16_136] : memref<16x32xf32, #tpu.memory_space<vmem>>, vector<8x16xf32>
    tpu.vector_store %arg22[%c8_135, %c16_136], %311 {strides = array<i32>} : memref<16x32xf32, #tpu.memory_space<vmem>>, vector<8x16xf32>,
    %c0_137 = arith.constant 0 : index
    %c0_138 = arith.constant 0 : index
    %313 = vector.load %arg22[%c0_137, %c0_138] : memref<16x32xf32, #tpu.memory_space<vmem>>, vector<16x32xf32>
    %c1_139 = arith.constant 1 : index
    %c0_140 = arith.constant 0 : index
    %c0_141 = arith.constant 0 : index
    %314 = vector.load %arg6[%c1_139, %c0_140, %c0_141] : memref<2x32x32xf32, #tpu.memory_space<vmem>>, vector<1x32x32xf32>
    %315 = vector.shape_cast %314 : vector<1x32x32xf32> to vector<32x32xf32>
    %cst_142 = arith.constant dense<0.000000e+00> : vector<16x32xf32>
    %316 = tpu.matmul %313, %315, %cst_142 {dimension_numbers = #tpu.dot_dimension_numbers<[1], [0], [0], [1], [0, 0, 1, 1], [], []>} : vector<16x32xf32>, vector<32x32xf32>, vector<16x32xf32> -> vector<16x32xf32>
    %c1_143 = arith.constant 1 : index
    %c0_144 = arith.constant 0 : index
    %c0_145 = arith.constant 0 : index
    %317 = vector.load %arg7[%c1_143, %c0_144, %c0_145] : memref<2x1x32xf32, #tpu.memory_space<vmem>>, vector<1x1x32xf32>
    %318 = vector.shape_cast %317 : vector<1x1x32xf32> to vector<1x32xf32>
    %319 = vector.broadcast %318 : vector<1x32xf32> to vector<16x32xf32>
    %320 = arith.addf %316, %319 : vector<16x32xf32>
    %321 = arith.addf %215, %320 : vector<16x32xf32>
    %c1_146 = arith.constant 1 : index
    %c0_147 = arith.constant 0 : index
    %c0_148 = arith.constant 0 : index
    %322 = vector.load %arg8[%c1_146, %c0_147, %c0_148] : memref<2x1x32xf32, #tpu.memory_space<vmem>>, vector<1x1x32xf32>
    %323 = vector.shape_cast %322 : vector<1x1x32xf32> to vector<1x32xf32>
    %c1_149 = arith.constant 1 : index
    %c0_150 = arith.constant 0 : index
    %c0_151 = arith.constant 0 : index
    %324 = vector.load %arg9[%c1_149, %c0_150, %c0_151] : memref<2x1x32xf32, #tpu.memory_space<vmem>>, vector<1x1x32xf32>
    %325 = vector.shape_cast %324 : vector<1x1x32xf32> to vector<1x32xf32>
    %cst_152 = arith.constant dense<0.000000e+00> : vector<16xf32>
    %326 = vector.multi_reduction <add>, %321, %cst_152 [1] : vector<16x32xf32> to vector<16xf32>
    %327 = vector.shape_cast %326 : vector<16xf32> to vector<16x1xf32>
    %cst_153 = arith.constant 3.200000e+01 : f32
    %328 = vector.broadcast %cst_153 : f32 to vector<16x1xf32>
    %329 = arith.divf %327, %328 : vector<16x1xf32>
    %330 = vector.broadcast %329 : vector<16x1xf32> to vector<16x32xf32>
    %331 = arith.subf %321, %330 : vector<16x32xf32>
    %332 = arith.mulf %331, %331 : vector<16x32xf32>
    %cst_154 = arith.constant dense<0.000000e+00> : vector<16xf32>
    %333 = vector.multi_reduction <add>, %332, %cst_154 [1] : vector<16x32xf32> to vector<16xf32>
    %334 = vector.shape_cast %333 : vector<16xf32> to vector<16x1xf32>
    %cst_155 = arith.constant 3.200000e+01 : f32
    %335 = vector.broadcast %cst_155 : f32 to vector<16x1xf32>
    %336 = arith.divf %334, %335 : vector<16x1xf32>
    %337 = vector.broadcast %329 : vector<16x1xf32> to vector<16x32xf32>
    %338 = arith.subf %321, %337 : vector<16x32xf32>
    %cst_156 = arith.constant 9.99999996E-13 : f32
    %339 = vector.broadcast %cst_156 : f32 to vector<16x1xf32>
    %340 = arith.addf %336, %339 : vector<16x1xf32>
    %341 = math.rsqrt %340 : vector<16x1xf32>
    %342 = vector.broadcast %341 : vector<16x1xf32> to vector<16x32xf32>
    %343 = arith.mulf %338, %342 : vector<16x32xf32>
    %344 = vector.broadcast %323 : vector<1x32xf32> to vector<16x32xf32>
    %345 = arith.mulf %343, %344 : vector<16x32xf32>
    %346 = vector.broadcast %325 : vector<1x32xf32> to vector<16x32xf32>
    %347 = arith.addf %345, %346 : vector<16x32xf32>
    %c1_157 = arith.constant 1 : index
    %c0_158 = arith.constant 0 : index
    %c0_159 = arith.constant 0 : index
    %348 = vector.load %arg10[%c1_157, %c0_158, %c0_159] : memref<2x32x64xf32, #tpu.memory_space<vmem>>, vector<1x32x64xf32>
    %349 = vector.shape_cast %348 : vector<1x32x64xf32> to vector<32x64xf32>
    %cst_160 = arith.constant dense<0.000000e+00> : vector<16x64xf32>
    %350 = tpu.matmul %347, %349, %cst_160 {dimension_numbers = #tpu.dot_dimension_numbers<[1], [0], [0], [1], [0, 0, 1, 1], [], []>} : vector<16x32xf32>, vector<32x64xf32>, vector<16x64xf32> -> vector<16x64xf32>
    %c1_161 = arith.constant 1 : index
    %c0_162 = arith.constant 0 : index
    %c0_163 = arith.constant 0 : index
    %351 = vector.load %arg11[%c1_161, %c0_162, %c0_163] : memref<2x1x64xf32, #tpu.memory_space<vmem>>, vector<1x1x64xf32>
    %352 = vector.shape_cast %351 : vector<1x1x64xf32> to vector<1x64xf32>
    %353 = vector.broadcast %352 : vector<1x64xf32> to vector<16x64xf32>
    %354 = arith.addf %350, %353 : vector<16x64xf32>
    %355 = arith.mulf %354, %354 : vector<16x64xf32>
    %356 = arith.mulf %354, %355 : vector<16x64xf32>
    %cst_164 = arith.constant 4.471500e-02 : f32
    %357 = vector.broadcast %cst_164 : f32 to vector<16x64xf32>
    %358 = arith.mulf %357, %356 : vector<16x64xf32>
    %359 = arith.addf %354, %358 : vector<16x64xf32>
    %cst_165 = arith.constant 0.797884583 : f32
    %360 = vector.broadcast %cst_165 : f32 to vector<16x64xf32>
    %361 = arith.mulf %360, %359 : vector<16x64xf32>
    %362 = math.tanh %361 : vector<16x64xf32>
    %cst_166 = arith.constant 1.000000e+00 : f32
    %363 = vector.broadcast %cst_166 : f32 to vector<16x64xf32>
    %364 = arith.addf %363, %362 : vector<16x64xf32>
    %cst_167 = arith.constant 5.000000e-01 : f32
    %365 = vector.broadcast %cst_167 : f32 to vector<16x64xf32>
    %366 = arith.mulf %365, %364 : vector<16x64xf32>
    %367 = arith.mulf %354, %366 : vector<16x64xf32>
    %c1_168 = arith.constant 1 : index
    %c0_169 = arith.constant 0 : index
    %c0_170 = arith.constant 0 : index
    %368 = vector.load %arg12[%c1_168, %c0_169, %c0_170] : memref<2x64x32xf32, #tpu.memory_space<vmem>>, vector<1x64x32xf32>
    %369 = vector.shape_cast %368 : vector<1x64x32xf32> to vector<64x32xf32>
    %cst_171 = arith.constant dense<0.000000e+00> : vector<16x32xf32>
    %370 = tpu.matmul %367, %369, %cst_171 {dimension_numbers = #tpu.dot_dimension_numbers<[1], [0], [0], [1], [0, 0, 1, 1], [], []>} : vector<16x64xf32>, vector<64x32xf32>, vector<16x32xf32> -> vector<16x32xf32>
    %c1_172 = arith.constant 1 : index
    %c0_173 = arith.constant 0 : index
    %c0_174 = arith.constant 0 : index
    %371 = vector.load %arg13[%c1_172, %c0_173, %c0_174] : memref<2x1x32xf32, #tpu.memory_space<vmem>>, vector<1x1x32xf32>
    %372 = vector.shape_cast %371 : vector<1x1x32xf32> to vector<1x32xf32>
    %373 = vector.broadcast %372 : vector<1x32xf32> to vector<16x32xf32>
    %374 = arith.addf %370, %373 : vector<16x32xf32>
    %375 = arith.addf %347, %374 : vector<16x32xf32>
    %c1_175 = arith.constant 1 : index
    %c0_176 = arith.constant 0 : index
    %c0_177 = arith.constant 0 : index
    %376 = vector.load %arg14[%c1_175, %c0_176, %c0_177] : memref<2x1x32xf32, #tpu.memory_space<vmem>>, vector<1x1x32xf32>
    %377 = vector.shape_cast %376 : vector<1x1x32xf32> to vector<1x32xf32>
    %c1_178 = arith.constant 1 : index
    %c0_179 = arith.constant 0 : index
    %c0_180 = arith.constant 0 : index
    %378 = vector.load %arg15[%c1_178, %c0_179, %c0_180] : memref<2x1x32xf32, #tpu.memory_space<vmem>>, vector<1x1x32xf32>
    %379 = vector.shape_cast %378 : vector<1x1x32xf32> to vector<1x32xf32>
    %cst_181 = arith.constant dense<0.000000e+00> : vector<16xf32>
    %380 = vector.multi_reduction <add>, %375, %cst_181 [1] : vector<16x32xf32> to vector<16xf32>
    %381 = vector.shape_cast %380 : vector<16xf32> to vector<16x1xf32>
    %cst_182 = arith.constant 3.200000e+01 : f32
    %382 = vector.broadcast %cst_182 : f32 to vector<16x1xf32>
    %383 = arith.divf %381, %382 : vector<16x1xf32>
    %384 = vector.broadcast %383 : vector<16x1xf32> to vector<16x32xf32>
    %385 = arith.subf %375, %384 : vector<16x32xf32>
    %386 = arith.mulf %385, %385 : vector<16x32xf32>
    %cst_183 = arith.constant dense<0.000000e+00> : vector<16xf32>
    %387 = vector.multi_reduction <add>, %386, %cst_183 [1] : vector<16x32xf32> to vector<16xf32>
    %388 = vector.shape_cast %387 : vector<16xf32> to vector<16x1xf32>
    %cst_184 = arith.constant 3.200000e+01 : f32
    %389 = vector.broadcast %cst_184 : f32 to vector<16x1xf32>
    %390 = arith.divf %388, %389 : vector<16x1xf32>
    %391 = vector.broadcast %383 : vector<16x1xf32> to vector<16x32xf32>
    %392 = arith.subf %375, %391 : vector<16x32xf32>
    %cst_185 = arith.constant 9.99999996E-13 : f32
    %393 = vector.broadcast %cst_185 : f32 to vector<16x1xf32>
    %394 = arith.addf %390, %393 : vector<16x1xf32>
    %395 = math.rsqrt %394 : vector<16x1xf32>
    %396 = vector.broadcast %395 : vector<16x1xf32> to vector<16x32xf32>
    %397 = arith.mulf %392, %396 : vector<16x32xf32>
    %398 = vector.broadcast %377 : vector<1x32xf32> to vector<16x32xf32>
    %399 = arith.mulf %397, %398 : vector<16x32xf32>
    %400 = vector.broadcast %379 : vector<1x32xf32> to vector<16x32xf32>
    %401 = arith.addf %399, %400 : vector<16x32xf32>
    %402 = vector.shape_cast %401 : vector<16x32xf32> to vector<2x8x32xf32>
    %c2 = arith.constant 2 : index
    %c0_186 = arith.constant 0 : index
    %c0_187 = arith.constant 0 : index
    %c0_188 = arith.constant 0 : index
    %403 = vector.load %arg19[%c2, %c0_186, %c0_187, %c0_188] : memref<3x2x8x32xf32, #tpu.memory_space<vmem>>, vector<1x2x8x32xf32>
    %404 = vector.shape_cast %403 : vector<1x2x8x32xf32> to vector<2x8x32xf32>
    %405 = vector.shape_cast %402 : vector<2x8x32xf32> to vector<1x2x8x32xf32>
    tpu.vector_store %arg19[%c2, %c0_186, %c0_187, %c0_188], %405 {strides = array<i32>} : memref<3x2x8x32xf32, #tpu.memory_space<vmem>>, vector<1x2x8x32xf32>,
    %406 = tpu.iota {dimensions = array<i32: 1>} : vector<2x16xi32>
    %407 = tpu.iota {dimensions = array<i32: 0>} : vector<2x16xi32>
    %c8_i32 = arith.constant 8 : i32
    %408 = vector.broadcast %c8_i32 : i32 to vector<2x16xi32>
    %409 = arith.muli %407, %408 : vector<2x16xi32>
    %410 = arith.cmpi eq, %406, %409 : vector<2x16xi32>
    %411 = arith.extui %410 : vector<2x16xi1> to vector<2x16xi32>
    %412 = arith.sitofp %411 : vector<2x16xi32> to vector<2x16xf32>
    %cst_189 = arith.constant dense<0.000000e+00> : vector<2x32xf32>
    %413 = tpu.matmul %412, %401, %cst_189 {dimension_numbers = #tpu.dot_dimension_numbers<[1], [0], [0], [1], [0, 0, 1, 1], [], []>} : vector<2x16xf32>, vector<16x32xf32>, vector<2x32xf32> -> vector<2x32xf32>
    %c0_190 = arith.constant 0 : index
    %c0_191 = arith.constant 0 : index
    %414 = vector.load %arg16[%c0_190, %c0_191] : memref<32x4xf32, #tpu.memory_space<vmem>>, vector<32x4xf32>
    %cst_192 = arith.constant dense<0.000000e+00> : vector<2x4xf32>
    %415 = tpu.matmul %413, %414, %cst_192 {dimension_numbers = #tpu.dot_dimension_numbers<[1], [0], [0], [1], [0, 0, 1, 1], [], []>} : vector<2x32xf32>, vector<32x4xf32>, vector<2x4xf32> -> vector<2x4xf32>
    %c0_193 = arith.constant 0 : index
    %c0_194 = arith.constant 0 : index
    %416 = vector.load %arg17[%c0_193, %c0_194] : memref<1x4xf32, #tpu.memory_space<vmem>>, vector<1x4xf32>
    %417 = vector.broadcast %416 : vector<1x4xf32> to vector<2x4xf32>
    %418 = arith.addf %415, %417 : vector<2x4xf32>
    %c0_195 = arith.constant 0 : index
    %c0_196 = arith.constant 0 : index
    %419 = vector.load %arg20[%c0_195, %c0_196] : memref<2x4xf32, #tpu.memory_space<vmem>>, vector<2x4xf32>
    tpu.vector_store %arg20[%c0_195, %c0_196], %418 {strides = array<i32>} : memref<2x4xf32, #tpu.memory_space<vmem>>, vector<2x4xf32>,
    %cst_197 = arith.constant dense<0xFF800000> : vector<2xf32>
    %420 = vector.multi_reduction <maximumf>, %418, %cst_197 [1] : vector<2x4xf32> to vector<2xf32>
    %421 = vector.shape_cast %420 : vector<2xf32> to vector<2x1xf32>
    %422 = vector.broadcast %421 : vector<2x1xf32> to vector<2x4xf32>
    %423 = arith.subf %418, %422 : vector<2x4xf32>
    %424 = math.exp %423 : vector<2x4xf32>
    %cst_198 = arith.constant dense<0.000000e+00> : vector<2xf32>
    %425 = vector.multi_reduction <add>, %424, %cst_198 [1] : vector<2x4xf32> to vector<2xf32>
    %426 = vector.shape_cast %425 : vector<2xf32> to vector<2x1xf32>
    %427 = math.log %426 : vector<2x1xf32>
    %428 = arith.addf %427, %421 : vector<2x1xf32>
    %429 = tpu.iota {dimensions = array<i32: 1>} : vector<2x4xi32>
    %430 = tpu.iota {dimensions = array<i32: 0>} : vector<2x4xi32>
    %c0_i32 = arith.constant 0 : i32
    %431 = vector.broadcast %c0_i32 : i32 to vector<2x4xi32>
    %c0_199 = arith.constant 0 : index
    %432 = memref.load %arg18[%c0_199] : memref<2xi32, #tpu.memory_space<smem>>
    %c0_i32_200 = arith.constant 0 : i32
    %433 = vector.broadcast %c0_i32_200 : i32 to vector<2x4xi32>
    %434 = arith.cmpi eq, %430, %433 : vector<2x4xi32>
    %435 = arith.extui %434 : vector<2x4xi1> to vector<2x4xi32>
    %436 = vector.broadcast %432 : i32 to vector<2x4xi32>
    %437 = arith.muli %436, %435 : vector<2x4xi32>
    %438 = arith.addi %431, %437 : vector<2x4xi32>
    %c1_201 = arith.constant 1 : index
    %439 = memref.load %arg18[%c1_201] : memref<2xi32, #tpu.memory_space<smem>>
    %c1_i32 = arith.constant 1 : i32
    %440 = vector.broadcast %c1_i32 : i32 to vector<2x4xi32>
    %441 = arith.cmpi eq, %430, %440 : vector<2x4xi32>
    %442 = arith.extui %441 : vector<2x4xi1> to vector<2x4xi32>
    %443 = vector.broadcast %439 : i32 to vector<2x4xi32>
    %444 = arith.muli %443, %442 : vector<2x4xi32>
    %445 = arith.addi %438, %444 : vector<2x4xi32>
    %446 = arith.cmpi eq, %429, %445 : vector<2x4xi32>
    %447 = arith.extui %446 : vector<2x4xi1> to vector<2x4xi32>
    %448 = arith.sitofp %447 : vector<2x4xi32> to vector<2x4xf32>
    %449 = arith.mulf %418, %448 : vector<2x4xf32>
    %cst_202 = arith.constant dense<0.000000e+00> : vector<2xf32>
    %450 = vector.multi_reduction <add>, %449, %cst_202 [1] : vector<2x4xf32> to vector<2xf32>
    %451 = vector.shape_cast %450 : vector<2xf32> to vector<2x1xf32>
    %452 = arith.subf %428, %451 : vector<2x1xf32>
    %453 = vector.shape_cast %452 : vector<2x1xf32> to vector<1x2x1xf32>
    %cst_203 = arith.constant dense<0.000000e+00> : vector<1xf32>
    %454 = vector.multi_reduction <add>, %453, %cst_203 [1, 2] : vector<1x2x1xf32> to vector<1xf32>
    %455 = vector.shape_cast %454 : vector<1xf32> to vector<1x1x1xf32>
    %456 = vector.extract %455[0, 0, 0] : f32 from vector<1x1x1xf32>
    %cst_204 = arith.constant 2.000000e+00 : f32
    %457 = arith.divf %456, %cst_204 : f32
    %c0_205 = arith.constant 0 : index
    %c0_206 = arith.constant 0 : index
    %458 = memref.load %arg21[%c0_205, %c0_206] : memref<1x1xf32, #tpu.memory_space<smem>>
    memref.store %457, %arg21[%c0_205, %c0_206] : memref<1x1xf32, #tpu.memory_space<smem>>
    return
  }
}

</mosaic_0001>

<bundles_post_ra>
// kernel: tpu_custom_call.1
= control target key start
LH: loop header
LB: loop body
LE: loop exit
PB: predicated region body
PF: predicated region fallthrough
CT: control target
= control target key end

     0   :  { %s3877_s0 = inlined_call_operand.vmem [shape: f32[16,32], index: 0, kind: input, shape index: {}]   ;;  %s3878_s1 = inlined_call_operand.vmem [shape: f32[2,8], index: 1, kind: input, shape index: {}]   ;;  %s3879_s2 = inlined_call_operand.vmem [shape: f32[1,32], index: 2, kind: input, shape index: {}]   ;;  %s3880_s3 = inlined_call_operand.vmem [shape: f32[1,32], index: 3, kind: input, shape index: {}]   ;;  %s3881_s4 = inlined_call_operand.vmem [shape: f32[2,32,96], index: 4, kind: input, shape index: {}]   ;;  %s3882_s5 = inlined_call_operand.vmem [shape: f32[2,1,96], index: 5, kind: input, shape index: {}]   ;;  %s3883_s6 = inlined_call_operand.vmem [shape: f32[2,32,32], index: 6, kind: input, shape index: {}]   ;;  %s3884_s7 = inlined_call_operand.vmem [shape: f32[2,1,32], index: 7, kind: input, shape index: {}]   ;;  %s3885_s8 = inlined_call_operand.vmem [shape: f32[2,1,32], index: 8, kind: input, shape index: {}]   ;;  %s3886_s9 = inlined_call_operand.vmem [shape: f32[2,1,32], index: 9, kind: input, shape index: {}]   ;;  %s3887_s10 = inlined_call_operand.vmem [shape: f32[2,32,64], index: 10, kind: input, shape index: {}]   ;;  %s3888_s11 = inlined_call_operand.vmem [shape: f32[2,1,64], index: 11, kind: input, shape index: {}]   ;;  %s3889_s12 = inlined_call_operand.vmem [shape: f32[2,64,32], index: 12, kind: input, shape index: {}]   ;;  %s3890_s13 = inlined_call_operand.vmem [shape: f32[2,1,32], index: 13, kind: input, shape index: {}]   ;;  %s3891_s14 = inlined_call_operand.vmem [shape: f32[2,1,32], index: 14, kind: input, shape index: {}]   ;;  %s3892_s15 = inlined_call_operand.vmem [shape: f32[2,1,32], index: 15, kind: input, shape index: {}]   ;;  %s3893_s16 = inlined_call_operand.vmem [shape: f32[32,4], index: 16, kind: input, shape index: {}]   ;;  %s3894_s17 = inlined_call_operand.vmem [shape: f32[1,4], index: 17, kind: input, shape index: {}]   ;;  %s3895_s18 = inlined_call_operand.vmem [shape: s32[2], index: 18, kind: input, shape index: {}]   ;;  %s3896_s19 = inlined_call_operand.hbm [shape: f32[3,2,8,32], index: 19, kind: output, shape index: {0}]   ;;  %s3897_s20 = inlined_call_operand.hbm [shape: f32[2,4], index: 20, kind: output, shape index: {1}]   ;;  %s3898_s21 = inlined_call_operand.hbm [shape: f32[1,1], index: 21, kind: output, shape index: {2}]  }
   0x1   :  { %3902 = sst [smem:[#allocation15_spill]] %s3877_s0 }
   0x2   :  { %3903 = sst [smem:[#allocation16_spill]] %s3878_s1 }
   0x3   :  { %3904 = sst [smem:[#allocation17_spill]] %s3879_s2 }
   0x4   :  { %3905 = sst [smem:[#allocation18_spill]] %s3880_s3 }
   0x5   :  { %3906 = sst [smem:[#allocation19_spill]] %s3881_s4 }
   0x6   :  { %3907 = sst [smem:[#allocation20_spill]] %s3882_s5 }
   0x7   :  { %27 = vsyncpa [#allocation6], 0 }
   0x8   :  { %28 = vsyncpa [#allocation4], 0 }
   0x9   :  { %29 = vsyncpa [#allocation9], 0 }
   0xa   :  { %30 = vsyncpa [#allocation5], 0  ;;  %s73_s26 = sshll.u32 %s3895_s18, 4  ;;  %s74_s26 = int_to_ptr.vmem [resolvable:$true] %s73_s26 }
   0xb   :  { %s3217_s27 = scalar_lea.vmem %s74_s26, 16  ;;  %p3222_p1 = scmp.lt.s32.totalorder %s74_s26, %s74_s26 }
   0xc   :  { %p3218_p0 = scmp.ne.s32.totalorder %s74_s26, %s3217_s27  ;;  %p3223_p2 = scmp.lt.s32.totalorder %s3217_s27, %s3217_s27 }
   0xe   :  { %p3224_p3 = por %p3223_p2, %p3222_p1 }
  0x10   :  { %p3225_p4 = pnand %p3224_p3, %p3218_p0 }
  0x12   :  { %3228 = shalt.err (!%p3225_p4)
}
  0x13   :  { %s3285_s3 = smov [#allocation3]  }
  0x14   :  { %76 = dma.vmem_to_smem %s74_s26, 16, %s3285_s3, [#allocation6]  }
  0x15   :  { %3277 = dma.done.wait [#allocation6], 16  }
  0x16   :  { %3278 = vsyncadd [#allocation6], 4294967280 }
  0x17   :  { %80 = sfence }
  0x18   :  { %s3908_s0 = sld [smem:[#allocation15_spill]]  ;;  %vm85_vm0 = vcmask 261120   ;;  %v3286_v34 = vmov 0.0   ;;  %vm3287_vm1 = vmmov 0   ;;  %s3288_s23 = smov 80   ;;  %vm229_vm2 = vcmask 130048  }
  0x19   :  { %s3909_s22 = sld [smem:[#allocation19_spill]]  ;;  %2945 = vmatprep.subr.mxu1 %v3286_v34  ;;  %2947 = vmatprep.mubr.msk.f32.mxu1 %vm3287_vm1, %v3286_v34  ;;  %s3289_s1 = smov 96   ;;  %v305_v46 = vlaneseq  ;;  %vm310_vm3 = vcmask 64512   ;;  %vm570_vm4 = vcmask 261248   ;;  %vm1180_vm5 = vcmask 523264  }
  0x1a   :  { %s3910_s28 = sld [smem:[#allocation17_spill]]  ;;  %s3290_s24 = smov 112   ;;  %vm2653_vm10 = vcmask 25600   ;;  %vm2686_vm11 = vcmask 1024  }
  0x1b   :  { %s3911_s4 = sld [smem:[#allocation18_spill]]  ;;  %v3501_v49 = vshrl.u32 %v305_v46, 7  ;;  %s3291_s27 = smov 48  }
  0x1c   :  { %s3912_s5 = sld [smem:[#allocation20_spill]]  ;;  %s3292_s3 = smov 64  }
  0x1d   :  { %s3913_s26 = sld [smem:[#allocation16_spill]]  ;;  %v307_v51 = vsub.s32 0, %v3501_v49  ;;  %v652_v60 = vsub.s32 1, %v3501_v49  ;;  %vm2668_vm7 = vcmp.eq.s32.totalorder %v3501_v49, 0  ;;  %vm2673_vm8 = vcmp.eq.s32.totalorder %v3501_v49, 1 }
  0x1e   :  { %v81_v0 = vld [vmem:[%s3908_s0] sm:$0xff]  ;;  %v82_v1 = vld [vmem:[%s3908_s0 + $0x8] sm:$0xff]  ;;  %s2667_s29 = sld [smem:[#allocation3]] }
  0x1f   :  { %v86_v2 = vsel %vm85_vm0, %v81_v0, 0.0  ;;  %v89_v3 = vsel %vm85_vm0, %v82_v1, 0.0  ;;  %v137_v14 = vld [vmem:[%s3909_s22 + $0x18] sm:$0xff]  ;;  %v136_v15 = vld [vmem:[%s3909_s22 + $0x10] sm:$0xff]  ;;  %v135_v16 = vld [vmem:[%s3909_s22 + $0x8] sm:$0xff] }
  0x20   :  { %87 = vadd.xlane.f32.xlu0 %v86_v2  ;;  %2934 = vmatprep.subr.mxu0 %v137_v14  ;;  %v134_v17 = vld [vmem:[%s3909_s22] sm:$0xff] }
  0x21   :  { %2935 = vmatpush3.msra.mxu0 %v137_v14  ;;  %v2746_v25 = vld [vmem:[%s3910_s28] ss:$0 sm:$0xff]  ;;  %s3293_s28 = smov 16  }
  0x22   :  { %2936 = vmatprep.subr.mxu0 %v136_v15  ;;  %v2747_v27 = vld [vmem:[%s3911_s4] ss:$0 sm:$0xff] }
  0x23   :  { %2937 = vmatpush3.msra.mxu0 %v136_v15  ;;  %v2748_v36 = vld [vmem:[%s3912_s5] ss:$0 sm:$0xff] }
  0x24   :  { %90 = vadd.xlane.f32.xlu0 %v89_v3  ;;  %2938 = vmatprep.subr.mxu0 %v135_v16  ;;  %v131_v47 = vld [vmem:[%s3913_s26] sm:$0x3] }
  0x25   :  { %2939 = vmatpush3.msra.mxu0 %v135_v16  ;;  %v132_v48 = vsub.f32 1.0, %v131_v47 }
  0x26   :  { %2940 = vmatprep.subr.mxu0 %v134_v17 }
  0x27   :  { %2941 = vmatpush3.msra.mxu0 %v134_v17  ;;  %v133_v50 = vmul.f32 -10000.0, %v132_v48 }
  0x28   :  { %2955 = vmatprep.subr.mxu0 %v3286_v34 }
  0x29   :  { %v3504_v52 = vrot.slane %v133_v50, %v307_v51 }
  0xa9   :  { %v88_v4 = vpop.xlane.xlu0 %87 }
  0xaa   :  { %v93_v5 = vmul.f32 0.03125, %v88_v4 }
  0xac   :  { %v95_v6 = vsub.f32 %v81_v0, %v93_v5  ;;  %v3511_v0 = vrot.slane %v133_v50, %v652_v60  ;;  %v919_v60 = vld [vmem:[%s3883_s6 + $0x10] sm:$0xff] }
  0xad   :  { %v91_v7 = vpop.xlane.xlu0 %90 }
  0xae   :  { %v94_v8 = vmul.f32 0.03125, %v91_v7  ;;  %v97_v9 = vmul.f32 %v95_v6, %v95_v6 }
  0xb0   :  { %v96_v10 = vsub.f32 %v82_v1, %v94_v8  ;;  %v99_v11 = vsel %vm85_vm0, %v97_v9, 0.0 }
  0xb1   :  { %100 = vadd.xlane.f32.xlu1 %v99_v11 }
  0xb2   :  { %v98_v12 = vmul.f32 %v96_v10, %v96_v10 }
  0xb4   :  { %v102_v13 = vsel %vm85_vm0, %v98_v12, 0.0 }
  0xb5   :  { %103 = vadd.xlane.f32.xlu1 %v102_v13 }
 0x13a   :  { %v101_v18 = vpop.xlane.xlu1 %100 }
 0x13b   :  { %v105_v19 = vmul.f32 0.03125, %v101_v18 }
 0x13d   :  { %v107_v20 = vadd.f32 1e-12, %v105_v19 }
 0x13e   :  { %v104_v21 = vpop.xlane.xlu1 %103 }
 0x13f   :  { %3153 = vrsqrt.f32 %v107_v20  ;;  %v106_v22 = vmul.f32 0.03125, %v104_v21 }
 0x141   :  { %v108_v23 = vadd.f32 1e-12, %v106_v22 }
 0x143   :  { %3155 = vrsqrt.f32 %v108_v23 }
 0x14c   :  { %v3154_v24 = vpop.eup %3153 }
 0x14d   :  { %v111_v26 = vmul.f32 %v3154_v24, %v95_v6 }
 0x14f   :  { %v119_v28 = vmul.f32 %v2746_v25, %v111_v26 }
 0x150   :  { %v3156_v29 = vpop.eup %3155 }
 0x151   :  { %v112_v30 = vmul.f32 %v3156_v29, %v96_v10  ;;  %v3441_v31 = vadd.f32 %v2747_v27, %v119_v28 }
 0x153   :  { %v120_v32 = vmul.f32 %v2746_v25, %v112_v30  ;;  %129 = vst.msk [vmem:[#allocation7] sm:$0xff] %vm85_vm0, %v3441_v31  ;;  %2942 = vmatprep.mubr.msk.f32.mxu0 %vm85_vm0, %v3441_v31 }
 0x155   :  { %v3447_v33 = vadd.f32 %v2747_v27, %v120_v32 }
 0x157   :  { %130 = vst.msk [vmem:[#allocation7 + $0x8] sm:$0xff] %vm85_vm0, %v3447_v33  ;;  %2943 = vmatmul.mubr.msk.f32.vlgmr.msra.gmra.mxu0 %vm85_vm0, %v3447_v33 }
 0x158   :  { %2957 = vmatprep.mubr.msk.f32.mxu0 %vm3287_vm1, %v3286_v34 }
 0x217   :  { %v2944_v35 = vpop.f32.mrf.mxu0 }
 0x218   :  { %v3468_v39 = vadd.f32 %v2944_v35, %v2748_v36 }
 0x219   :  { %v217_v37 = vpop.f32.mrf.mxu0 }
 0x21a   :  { %v3462_v38 = vadd.f32 %v2748_v36, %v217_v37 }
 0x21c   :  { %401 = vrot.lane.b32.xlu1 %v3462_v38, %s3288_s23  ;;  %227 = vrot.lane.b32.xlu0 %v3462_v38, %s3289_s1 }
 0x220   :  { %399 = vrot.lane.b32.xlu1 %v3462_v38, %s3290_s24  ;;  %745 = vrot.lane.b32.xlu0 %v3468_v39, %s3288_s23 }
 0x224   :  { %573 = vrot.lane.b32.xlu1 %v3468_v39, %s3289_s1 }
 0x228   :  { %743 = vrot.lane.b32.xlu1 %v3468_v39, %s3290_s24 }
 0x28e   :  { %v402_v40 = vpop.permute.xlu1 %401  ;;  %v228_v41 = vpop.permute.xlu0 %227 }
 0x28f   :  { %2946 = vmatpush3.xpose.msk.msra.mxu1 %vm229_vm2, %v228_v41  ;;  %2956 = vmatpush3.xpose.msk.msra.mxu0 %vm229_vm2, %v402_v40 }
 0x290   :  { %2965 = vmatprep.subr.mxu0 %v3286_v34  ;;  %2950 = vmatprep.subr.mxu1 %v3286_v34 }
 0x292   :  { %v400_v42 = vpop.permute.xlu1 %399  ;;  %2948 = vmatmul.mubr.msk.f32.vlgmr.msra.gmra.mxu1 %vm229_vm2, %v3462_v38  ;;  %v746_v44 = vpop.permute.xlu0 %745 }
 0x293   :  { %2958 = vmatmul.mubr.msk.f32.vlgmr.msra.gmra.mxu0 %vm229_vm2, %v400_v42  ;;  %2952 = vmatprep.mubr.msk.f32.mxu1 %vm3287_vm1, %v3286_v34 }
 0x294   :  { %2967 = vmatprep.mubr.msk.f32.mxu0 %vm3287_vm1, %v3286_v34 }
 0x296   :  { %v574_v43 = vpop.permute.xlu1 %573 }
 0x297   :  { %2966 = vmatpush3.xpose.msk.msra.mxu0 %vm229_vm2, %v574_v43 }
 0x298   :  { %2975 = vmatprep.subr.mxu0 %v3286_v34 }
 0x29a   :  { %2968 = vmatmul.mubr.msk.f32.vlgmr.msra.gmra.mxu0 %vm229_vm2, %v3468_v39  ;;  %v744_v45 = vpop.permute.xlu1 %743 }
 0x29b   :  { %2976 = vmatpush3.xpose.msk.msra.mxu0 %vm229_vm2, %v746_v44  ;;  %2977 = vmatprep.mubr.msk.f32.mxu0 %vm3287_vm1, %v3286_v34 }
 0x29e   :  { %2978 = vmatmul.mubr.msk.f32.vlgmr.msra.gmra.mxu0 %vm229_vm2, %v744_v45 }
 0x352   :  { %v300_v53 = vpop.f32.mrf.mxu1 }
 0x353   :  { %v304_v54 = vmul.f32 0.25, %v300_v53  ;;  %v473_v55 = vpop.f32.mrf.mxu0 }
 0x354   :  { %v477_v56 = vmul.f32 0.25, %v473_v55  ;;  %v2949_v57 = vpop.f32.mrf.mxu1 }
 0x355   :  { %v2959_v58 = vpop.f32.mrf.mxu0  ;;  %v309_v59 = vadd.f32 %v3504_v52, %v304_v54 }
 0x356   :  { %v478_v61 = vadd.f32 %v477_v56, %v3504_v52 }
 0x357   :  { %v311_v62 = vsel %vm310_vm3, %v309_v59, -inf }
 0x358   :  { %312 = vmax.xlane.f32.xlu0 %v311_v62  ;;  %v479_v63 = vsel %vm310_vm3, %v478_v61, -inf  ;;  %v917_v62 = vld [vmem:[%s3883_s6] sm:$0xff] }
 0x359   :  { %480 = vmax.xlane.f32.xlu1 %v479_v63 }
 0x35a   :  { %v645_v1 = vpop.f32.mrf.mxu0 }
 0x35b   :  { %v649_v2 = vmul.f32 0.25, %v645_v1 }
 0x35c   :  { %v2969_v3 = vpop.f32.mrf.mxu0 }
 0x35d   :  { %v654_v4 = vadd.f32 %v3511_v0, %v649_v2 }
 0x35e   :  { %v817_v5 = vpop.f32.mrf.mxu0 }
 0x35f   :  { %v821_v6 = vmul.f32 0.25, %v817_v5  ;;  %v655_v7 = vsel %vm310_vm3, %v654_v4, -inf }
 0x360   :  { %656 = vmax.xlane.f32.xlu0 %v655_v7  ;;  %v2979_v8 = vpop.f32.mrf.mxu0 }
 0x361   :  { %v822_v9 = vadd.f32 %v821_v6, %v3511_v0  ;;  %v2763_v6 = vld [vmem:[%s3884_s7] ss:$0 sm:$0xff] }
 0x363   :  { %v823_v10 = vsel %vm310_vm3, %v822_v9, -inf }
 0x364   :  { %824 = vmax.xlane.f32.xlu0 %v823_v10 }
 0x3e1   :  { %v313_v11 = vpop.xlane.xlu0 %312 }
 0x3e2   :  { %v314_v12 = vsub.f32 %v309_v59, %v313_v11  ;;  %v481_v13 = vpop.xlane.xlu1 %480  ;;  %v920_v59 = vld [vmem:[%s3883_s6 + $0x18] sm:$0xff] }
 0x3e3   :  { %v482_v14 = vsub.f32 %v478_v61, %v481_v13  ;;  %2985 = vmatprep.subr.mxu0 %v920_v59  ;;  %v918_v61 = vld [vmem:[%s3883_s6 + $0x8] sm:$0xff] }
 0x3e4   :  { %v315_v15 = vmul.f32 1.442695, %v314_v12  ;;  %2986 = vmatpush3.msra.mxu0 %v920_v59 }
 0x3e5   :  { %v483_v16 = vmul.f32 1.442695, %v482_v14  ;;  %2987 = vmatprep.subr.mxu0 %v919_v60 }
 0x3e6   :  { %3157 = vpow2.f32 %v315_v15  ;;  %2988 = vmatpush3.msra.mxu0 %v919_v60 }
 0x3e7   :  { %3159 = vpow2.f32 %v483_v16  ;;  %2989 = vmatprep.subr.mxu0 %v918_v61 }
 0x3e8   :  { %2990 = vmatpush3.msra.mxu0 %v918_v61 }
 0x3e9   :  { %v657_v17 = vpop.xlane.xlu0 %656  ;;  %2991 = vmatprep.subr.mxu0 %v917_v62 }
 0x3ea   :  { %v658_v18 = vsub.f32 %v654_v4, %v657_v17  ;;  %2992 = vmatpush3.msra.mxu0 %v917_v62 }
 0x3ec   :  { %v659_v19 = vmul.f32 1.442695, %v658_v18 }
 0x3ed   :  { %v825_v26 = vpop.xlane.xlu0 %824 }
 0x3ee   :  { %3161 = vpow2.f32 %v659_v19  ;;  %v826_v27 = vsub.f32 %v822_v9, %v825_v26  ;;  %v1055_v26 = vld [vmem:[%s3887_s10] sm:$0xff] }
 0x3f0   :  { %v827_v28 = vmul.f32 1.442695, %v826_v27 }
 0x3f2   :  { %3163 = vpow2.f32 %v827_v28 }
 0x3f3   :  { %v3158_v20 = vpop.eup %3157 }
 0x3f4   :  { %v3160_v21 = vpop.eup %3159  ;;  %v317_v22 = vsel %vm310_vm3, %v3158_v20, 0.0 }
 0x3f5   :  { %318 = vadd.xlane.f32.xlu0 %v317_v22  ;;  %v485_v23 = vsel %vm310_vm3, %v3160_v21, 0.0 }
 0x3f6   :  { %486 = vadd.xlane.f32.xlu1 %v485_v23 }
 0x3fb   :  { %v3162_v24 = vpop.eup %3161 }
 0x3fc   :  { %v661_v25 = vsel %vm310_vm3, %v3162_v24, 0.0 }
 0x3fd   :  { %662 = vadd.xlane.f32.xlu0 %v661_v25  ;;  %v1056_v25 = vld [vmem:[%s3887_s10 + $0x8] sm:$0xff] }
 0x3ff   :  { %v3164_v29 = vpop.eup %3163 }
 0x400   :  { %v829_v30 = vsel %vm310_vm3, %v3164_v29, 0.0 }
 0x407   :  { %490 = vrot.lane.b32.xlu1 %v3462_v38, %s3291_s27 }
 0x40b   :  { %666 = vrot.lane.b32.xlu1 %v3468_v39, %s3292_s3 }
 0x413   :  { %322 = vrot.lane.b32.xlu0 %v3462_v38, %s3292_s3 }
 0x42f   :  { %830 = vadd.xlane.f32.xlu1 %v829_v30 }
 0x440   :  { %834 = vrot.lane.b32.xlu1 %v3468_v39, %s3291_s27 }
 0x47e   :  { %v319_v32 = vpop.xlane.xlu0 %318 }
 0x47f   :  { %3165 = vrcp.f32 %v319_v32  ;;  %v487_v35 = vpop.xlane.xlu1 %486 }
 0x480   :  { %3167 = vrcp.f32 %v487_v35 }
 0x483   :  { %v491_v38 = vpop.permute.xlu1 %490 }
 0x486   :  { %v663_v36 = vpop.xlane.xlu0 %662 }
 0x487   :  { %3169 = vrcp.f32 %v663_v36  ;;  %v667_v43 = vpop.permute.xlu1 %666 }
 0x48a   :  { %v323_v37 = vpop.permute.xlu0 %322 }
 0x48b   :  { %2951 = vmatpush3.msra.mxu1 %v323_v37  ;;  %v2766_v37 = vld [vmem:[%s3885_s8] ss:$0 sm:$0xff] }
 0x48c   :  { %v3166_v40 = vpop.eup %3165  ;;  %2960 = vmatprep.subr.mxu1 %v3286_v34 }
 0x48d   :  { %v321_v41 = vmul.f32 %v3166_v40, %v3158_v20  ;;  %v3168_v42 = vpop.eup %3167 }
 0x48e   :  { %v489_v39 = vmul.f32 %v3168_v42, %v3160_v21 }
 0x48f   :  { %2953 = vmatmul.mubr.msk.f32.vlgmr.msra.gmra.mxu1 %vm310_vm3, %v321_v41 }
 0x490   :  { %2961 = vmatpush3.msra.mxu1 %v491_v38  ;;  %2962 = vmatprep.mubr.msk.f32.mxu1 %vm3287_vm1, %v3286_v34  ;;  %v2767_v38 = vld [vmem:[%s3886_s9] ss:$0 sm:$0xff] }
 0x491   :  { %2970 = vmatprep.subr.mxu1 %v3286_v34 }
 0x493   :  { %2963 = vmatmul.mubr.msk.f32.vlgmr.msra.gmra.mxu1 %vm310_vm3, %v489_v39 }
 0x494   :  { %v3170_v44 = vpop.eup %3169  ;;  %2971 = vmatpush3.msra.mxu1 %v667_v43  ;;  %2972 = vmatprep.mubr.msk.f32.mxu1 %vm3287_vm1, %v3286_v34 }
 0x495   :  { %v665_v45 = vmul.f32 %v3170_v44, %v3162_v24  ;;  %2980 = vmatprep.subr.mxu1 %v3286_v34  ;;  %v1057_v24 = vld [vmem:[%s3887_s10 + $0x10] sm:$0xff] }
 0x497   :  { %2973 = vmatmul.mubr.msk.f32.vlgmr.msra.gmra.mxu1 %vm310_vm3, %v665_v45 }
 0x498   :  { %2982 = vmatprep.mubr.msk.f32.mxu1 %vm3287_vm1, %v3286_v34 }
 0x4b8   :  { %v831_v47 = vpop.xlane.xlu1 %830 }
 0x4b9   :  { %3171 = vrcp.f32 %v831_v47  ;;  %v1172_v47 = vld [vmem:[%s3889_s12 + $0x38] sm:$0xff] }
 0x4ba   :  { %3007 = vmatprep.subr.mxu0 %v1172_v47 }
 0x4bc   :  { %v835_v48 = vpop.permute.xlu1 %834 }
 0x4bd   :  { %2981 = vmatpush3.msra.mxu1 %v835_v48  ;;  %v1171_v48 = vld [vmem:[%s3889_s12 + $0x30] sm:$0xff] }
 0x4c6   :  { %v3172_v50 = vpop.eup %3171 }
 0x4c7   :  { %v833_v51 = vmul.f32 %v3172_v50, %v3164_v29  ;;  %v1170_v50 = vld [vmem:[%s3889_s12 + $0x28] sm:$0xff] }
 0x4c9   :  { %2983 = vmatmul.mubr.msk.f32.vlgmr.msra.gmra.mxu1 %vm310_vm3, %v833_v51  ;;  %v1169_v51 = vld [vmem:[%s3889_s12 + $0x20] sm:$0xff] }
 0x54f   :  { %v394_v53 = vpop.f32.mrf.mxu1 }
 0x550   :  { %398 = vst.msk [vmem:[#allocation2] sm:$0xff] %vm229_vm2, %v394_v53  ;;  %v1168_v53 = vld [vmem:[%s3889_s12 + $0x18] sm:$0xff] }
 0x551   :  { %v2954_v54 = vpop.f32.mrf.mxu1 }
 0x552   :  { %v1167_v54 = vld [vmem:[%s3889_s12 + $0x10] sm:$0xff] }
 0x553   :  { %v562_v55 = vpop.f32.mrf.mxu1 }
 0x554   :  { %567 = vrot.lane.b32.xlu0 %v562_v55, %s3293_s28  ;;  %v1166_v55 = vld [vmem:[%s3889_s12 + $0x8] sm:$0xff] }
 0x555   :  { %v2964_v56 = vpop.f32.mrf.mxu1 }
 0x556   :  { %v1165_v56 = vld [vmem:[%s3889_s12] sm:$0xff] }
 0x557   :  { %v738_v57 = vpop.f32.mrf.mxu1 }
 0x558   :  { %742 = vst.msk [vmem:[#allocation2 + $0x8] sm:$0xff] %vm229_vm2, %v738_v57  ;;  %v2768_v57 = vld [vmem:[%s3888_s11] ss:$0 sm:$0xff] }
 0x559   :  { %v2974_v58 = vpop.f32.mrf.mxu1 }
 0x589   :  { %v906_v63 = vpop.f32.mrf.mxu1 }
 0x58a   :  { %911 = vrot.lane.b32.xlu1 %v906_v63, %s3293_s28 }
 0x58b   :  { %v2984_v1 = vpop.f32.mrf.mxu1 }
 0x5c6   :  { %v568_v2 = vpop.permute.xlu0 %567 }
 0x5c7   :  { %571 = vst.msk [vmem:[#allocation2] sm:$0xff] %vm570_vm4, %v568_v2 }
 0x5ce   :  { %v915_v3 = vld [vmem:[#allocation2] sm:$0xff] }
 0x5cf   :  { %2993 = vmatprep.mubr.msk.f32.mxu0 %vm85_vm0, %v915_v3 }
 0x5fc   :  { %v912_v4 = vpop.permute.xlu1 %911 }
 0x5fd   :  { %914 = vst.msk [vmem:[#allocation2 + $0x8] sm:$0xff] %vm570_vm4, %v912_v4 }
 0x604   :  { %v916_v5 = vld [vmem:[#allocation2 + $0x8] sm:$0xff] }
 0x605   :  { %2994 = vmatmul.mubr.msk.f32.vlgmr.msra.gmra.mxu0 %vm85_vm0, %v916_v5 }
 0x606   :  { %3008 = vmatpush3.msra.mxu0 %v1172_v47 }
 0x607   :  { %3009 = vmatprep.subr.mxu0 %v1171_v48 }
 0x608   :  { %3010 = vmatpush3.msra.mxu0 %v1171_v48 }
 0x609   :  { %3011 = vmatprep.subr.mxu0 %v1170_v50 }
 0x60a   :  { %3012 = vmatpush3.msra.mxu0 %v1170_v50  ;;  %v2774_v50 = vld [vmem:[%s3891_s14] ss:$0 sm:$0xff] }
 0x60b   :  { %3013 = vmatprep.subr.mxu0 %v1169_v51 }
 0x60c   :  { %3014 = vmatpush3.msra.mxu0 %v1169_v51 }
 0x60d   :  { %3015 = vmatprep.subr.mxu0 %v1168_v53 }
 0x60e   :  { %3016 = vmatpush3.msra.mxu0 %v1168_v53 }
 0x60f   :  { %3017 = vmatprep.subr.mxu0 %v1167_v54 }
 0x610   :  { %3018 = vmatpush3.msra.mxu0 %v1167_v54  ;;  %v2775_v54 = vld [vmem:[%s3892_s15] ss:$0 sm:$0xff] }
 0x611   :  { %3019 = vmatprep.subr.mxu0 %v1166_v55 }
 0x612   :  { %3020 = vmatpush3.msra.mxu0 %v1166_v55 }
 0x613   :  { %3021 = vmatprep.subr.mxu0 %v1165_v56 }
 0x614   :  { %3022 = vmatpush3.msra.mxu0 %v1165_v56 }
 0x615   :  { %3047 = vmatprep.subr.mxu0 %v3286_v34 }
 0x6c5   :  { %v2995_v7 = vpop.f32.mrf.mxu0 }
 0x6c6   :  { %v1006_v8 = vadd.f32 %v2995_v7, %v2763_v6 }
 0x6c7   :  { %v1000_v9 = vpop.f32.mrf.mxu0 }
 0x6c8   :  { %v1001_v10 = vadd.f32 %v2763_v6, %v1000_v9  ;;  %v1010_v11 = vadd.f32 %v1006_v8, %v3447_v33 }
 0x6ca   :  { %v1016_v12 = vsel %vm85_vm0, %v1010_v11, 0.0  ;;  %v1009_v13 = vadd.f32 %v1001_v10, %v3441_v31  ;;  %v1058_v31 = vld [vmem:[%s3887_s10 + $0x18] sm:$0xff] }
 0x6cb   :  { %1017 = vadd.xlane.f32.xlu1 %v1016_v12  ;;  %2996 = vmatprep.subr.mxu1 %v1058_v31 }
 0x6cc   :  { %v1013_v14 = vsel %vm85_vm0, %v1009_v13, 0.0  ;;  %2997 = vmatpush3.msra.mxu1 %v1058_v31 }
 0x6cd   :  { %1014 = vadd.xlane.f32.xlu0 %v1013_v14  ;;  %2998 = vmatprep.subr.mxu1 %v1057_v24 }
 0x6ce   :  { %2999 = vmatpush3.msra.mxu1 %v1057_v24 }
 0x6cf   :  { %3000 = vmatprep.subr.mxu1 %v1056_v25 }
 0x6d0   :  { %3001 = vmatpush3.msra.mxu1 %v1056_v25 }
 0x6d1   :  { %3002 = vmatprep.subr.mxu1 %v1055_v26 }
 0x6d2   :  { %3003 = vmatpush3.msra.mxu1 %v1055_v26 }
 0x754   :  { %v1018_v15 = vpop.xlane.xlu1 %1017 }
 0x755   :  { %v1020_v16 = vmul.f32 0.03125, %v1018_v15 }
 0x756   :  { %v1015_v17 = vpop.xlane.xlu0 %1014 }
 0x757   :  { %v1019_v18 = vmul.f32 0.03125, %v1015_v17  ;;  %v1022_v19 = vsub.f32 %v1010_v11, %v1020_v16  ;;  %v2771_v17 = vld [vmem:[%s3890_s13] ss:$0 sm:$0xff] }
 0x759   :  { %v1021_v20 = vsub.f32 %v1009_v13, %v1019_v18  ;;  %v1024_v23 = vmul.f32 %v1022_v19, %v1022_v19 }
 0x75b   :  { %v1023_v21 = vmul.f32 %v1021_v20, %v1021_v20  ;;  %v1028_v33 = vsel %vm85_vm0, %v1024_v23, 0.0 }
 0x75d   :  { %v1025_v22 = vsel %vm85_vm0, %v1023_v21, 0.0 }
 0x75e   :  { %1026 = vadd.xlane.f32.xlu0 %v1025_v22 }
 0x762   :  { %1029 = vadd.xlane.f32.xlu0 %v1028_v33 }
 0x7e7   :  { %v1027_v27 = vpop.xlane.xlu0 %1026 }
 0x7e8   :  { %v1031_v28 = vmul.f32 0.03125, %v1027_v27 }
 0x7ea   :  { %v1033_v29 = vadd.f32 1e-12, %v1031_v28 }
 0x7eb   :  { %v1030_v30 = vpop.xlane.xlu0 %1029 }
 0x7ec   :  { %3173 = vrsqrt.f32 %v1033_v29  ;;  %v1032_v32 = vmul.f32 0.03125, %v1030_v30 }
 0x7ee   :  { %v1034_v35 = vadd.f32 1e-12, %v1032_v32 }
 0x7f0   :  { %3175 = vrsqrt.f32 %v1034_v35 }
 0x7f9   :  { %v3174_v36 = vpop.eup %3173 }
 0x7fa   :  { %v1037_v40 = vmul.f32 %v3174_v36, %v1021_v20 }
 0x7fc   :  { %v1045_v41 = vmul.f32 %v2766_v37, %v1037_v40  ;;  %v2778_v40 = vld [vmem:[%s3909_s22 + $0x30] sm:$0xff] }
 0x7fd   :  { %v3176_v42 = vpop.eup %3175 }
 0x7fe   :  { %v1038_v39 = vmul.f32 %v3176_v42, %v1022_v19  ;;  %v3589_v43 = vadd.f32 %v2767_v38, %v1045_v41  ;;  %v2776_v41 = vld [vmem:[%s3909_s22 + $0x20] sm:$0xff] }
 0x800   :  { %v1046_v44 = vmul.f32 %v2766_v37, %v1038_v39  ;;  %3004 = vmatprep.mubr.msk.f32.mxu1 %vm85_vm0, %v3589_v43  ;;  %v2779_v37 = vld [vmem:[%s3909_s22 + $0x38] sm:$0xff] }
 0x801   :  { %3026 = vmatprep.subr.mxu1 %v2779_v37 }
 0x802   :  { %v1054_v45 = vadd.f32 %v2767_v38, %v1046_v44  ;;  %v2777_v38 = vld [vmem:[%s3909_s22 + $0x28] sm:$0xff] }
 0x804   :  { %3005 = vmatmul.mubr.msk.f32.vlgmr.msra.gmra.mxu1 %vm85_vm0, %v1054_v45 }
 0x805   :  { %3027 = vmatpush3.msra.mxu1 %v2779_v37 }
 0x806   :  { %3028 = vmatprep.subr.mxu1 %v2778_v40 }
 0x807   :  { %3029 = vmatpush3.msra.mxu1 %v2778_v40 }
 0x808   :  { %3030 = vmatprep.subr.mxu1 %v2777_v38 }
 0x809   :  { %3031 = vmatpush3.msra.mxu1 %v2777_v38 }
 0x80a   :  { %3032 = vmatprep.subr.mxu1 %v2776_v41 }
 0x80b   :  { %3033 = vmatpush3.msra.mxu1 %v2776_v41 }
 0x80c   :  { %3037 = vmatprep.subr.mxu1 %v3286_v34 }
 0x8c4   :  { %v3006_v58 = vpop.f32.mrf.mxu1 }
 0x8c5   :  { %v1144_v59 = vadd.f32 %v3006_v58, %v2768_v57 }
 0x8c6   :  { %v1138_v60 = vpop.f32.mrf.mxu1 }
 0x8c7   :  { %v1148_v61 = vmul.f32 %v1144_v59, %v1144_v59  ;;  %v1139_v62 = vadd.f32 %v2768_v57, %v1138_v60 }
 0x8c9   :  { %v1150_v63 = vmul.f32 %v1148_v61, %v1144_v59  ;;  %v1147_v1 = vmul.f32 %v1139_v62, %v1139_v62  ;;  %v2781_v61 = vld [vmem:[%s3912_s5 + $0x1] ss:$0 sm:$0xff] }
 0x8cb   :  { %v1152_v2 = vmul.f32 0.044715, %v1150_v63  ;;  %v1149_v3 = vmul.f32 %v1147_v1, %v1139_v62 }
 0x8cd   :  { %v1154_v4 = vadd.f32 %v1152_v2, %v1144_v59  ;;  %v1151_v5 = vmul.f32 0.044715, %v1149_v3 }
 0x8cf   :  { %v1156_v6 = vmul.f32 0.7978846, %v1154_v4  ;;  %v1153_v7 = vadd.f32 %v1151_v5, %v1139_v62 }
 0x8d1   :  { %3177 = vtanh.f32 %v1156_v6  ;;  %v1155_v8 = vmul.f32 0.7978846, %v1153_v7 }
 0x8d3   :  { %3179 = vtanh.f32 %v1155_v8 }
 0x8de   :  { %v3178_v9 = vpop.eup %3177 }
 0x8df   :  { %v1160_v10 = vadd.f32 1.0, %v3178_v9 }
 0x8e0   :  { %v3180_v11 = vpop.eup %3179 }
 0x8e1   :  { %v1159_v12 = vadd.f32 1.0, %v3180_v11  ;;  %v1162_v13 = vmul.f32 0.5, %v1160_v10 }
 0x8e3   :  { %v1161_v14 = vmul.f32 0.5, %v1159_v12  ;;  %v1164_v16 = vmul.f32 %v1162_v13, %v1144_v59 }
 0x8e5   :  { %v1163_v15 = vmul.f32 %v1161_v14, %v1139_v62 }
 0x8e7   :  { %3023 = vmatprep.mubr.msk.f32.mxu0 %vm1180_vm5, %v1163_v15 }
 0x8e8   :  { %3024 = vmatmul.mubr.msk.f32.vlgmr.msra.gmra.mxu0 %vm1180_vm5, %v1164_v16 }
 0x8e9   :  { %3049 = vmatprep.mubr.msk.f32.mxu0 %vm3287_vm1, %v3286_v34 }
 0x9a8   :  { %v3025_v18 = vpop.f32.mrf.mxu0 }
 0x9a9   :  { %v1259_v19 = vadd.f32 %v3025_v18, %v2771_v17 }
 0x9aa   :  { %v1253_v20 = vpop.f32.mrf.mxu0 }
 0x9ab   :  { %v1254_v21 = vadd.f32 %v2771_v17, %v1253_v20  ;;  %v1263_v22 = vadd.f32 %v1259_v19, %v1054_v45 }
 0x9ad   :  { %v1269_v23 = vsel %vm85_vm0, %v1263_v22, 0.0  ;;  %v1262_v33 = vadd.f32 %v1254_v21, %v3589_v43 }
 0x9ae   :  { %1270 = vadd.xlane.f32.xlu1 %v1269_v23 }
 0x9af   :  { %v1266_v31 = vsel %vm85_vm0, %v1262_v33, 0.0 }
 0x9b0   :  { %1267 = vadd.xlane.f32.xlu0 %v1266_v31 }
 0xa37   :  { %v1271_v24 = vpop.xlane.xlu1 %1270 }
 0xa38   :  { %v1273_v25 = vmul.f32 0.03125, %v1271_v24 }
 0xa39   :  { %v1268_v26 = vpop.xlane.xlu0 %1267 }
 0xa3a   :  { %v1275_v27 = vsub.f32 %v1263_v22, %v1273_v25  ;;  %v1272_v28 = vmul.f32 0.03125, %v1268_v26 }
 0xa3c   :  { %v1274_v29 = vsub.f32 %v1262_v33, %v1272_v28  ;;  %v1277_v30 = vmul.f32 %v1275_v27, %v1275_v27 }
 0xa3e   :  { %v1281_v32 = vsel %vm85_vm0, %v1277_v30, 0.0  ;;  %v1276_v35 = vmul.f32 %v1274_v29, %v1274_v29 }
 0xa3f   :  { %1282 = vadd.xlane.f32.xlu1 %v1281_v32 }
 0xa40   :  { %v1278_v36 = vsel %vm85_vm0, %v1276_v35, 0.0 }
 0xa41   :  { %1279 = vadd.xlane.f32.xlu0 %v1278_v36 }
 0xac8   :  { %v1283_v42 = vpop.xlane.xlu1 %1282 }
 0xac9   :  { %v1285_v39 = vmul.f32 0.03125, %v1283_v42 }
 0xaca   :  { %v1280_v43 = vpop.xlane.xlu0 %1279 }
 0xacb   :  { %v1287_v44 = vadd.f32 1e-12, %v1285_v39  ;;  %v1284_v45 = vmul.f32 0.03125, %v1280_v43 }
 0xacd   :  { %3181 = vrsqrt.f32 %v1287_v44  ;;  %v1286_v47 = vadd.f32 1e-12, %v1284_v45 }
 0xacf   :  { %3183 = vrsqrt.f32 %v1286_v47 }
 0xada   :  { %v3182_v48 = vpop.eup %3181 }
 0xadb   :  { %v1291_v51 = vmul.f32 %v3182_v48, %v1275_v27 }
 0xadc   :  { %v3184_v53 = vpop.eup %3183 }
 0xadd   :  { %v1290_v55 = vmul.f32 %v3184_v53, %v1274_v29  ;;  %v1299_v56 = vmul.f32 %v2774_v50, %v1291_v51 }
 0xadf   :  { %v1298_v57 = vmul.f32 %v2774_v50, %v1290_v55  ;;  %v3653_v58 = vadd.f32 %v2775_v54, %v1299_v56 }
 0xae1   :  { %v3655_v59 = vadd.f32 %v2775_v54, %v1298_v57  ;;  %1310 = vst.msk [vmem:[#allocation7 + $0x18] sm:$0xff] %vm85_vm0, %v3653_v58 }
 0xae3   :  { %1309 = vst.msk [vmem:[#allocation7 + $0x10] sm:$0xff] %vm85_vm0, %v3655_v59  ;;  %3034 = vmatprep.mubr.msk.f32.mxu1 %vm85_vm0, %v3655_v59 }
 0xae4   :  { %3035 = vmatmul.mubr.msk.f32.vlgmr.msra.gmra.mxu1 %vm85_vm0, %v3653_v58 }
 0xae5   :  { %3039 = vmatprep.mubr.msk.f32.mxu1 %vm3287_vm1, %v3286_v34 }
 0xba4   :  { %v3036_v60 = vpop.f32.mrf.mxu1 }
 0xba5   :  { %v3676_v1 = vadd.f32 %v3036_v60, %v2781_v61 }
 0xba6   :  { %v1396_v62 = vpop.f32.mrf.mxu1 }
 0xba7   :  { %v3670_v63 = vadd.f32 %v2781_v61, %v1396_v62 }
 0xba9   :  { %1574 = vrot.lane.b32.xlu1 %v3670_v63, %s3288_s23  ;;  %1406 = vrot.lane.b32.xlu0 %v3670_v63, %s3289_s1 }
 0xbad   :  { %1572 = vrot.lane.b32.xlu1 %v3670_v63, %s3290_s24  ;;  %1913 = vrot.lane.b32.xlu0 %v3676_v1, %s3288_s23 }
 0xbb1   :  { %1745 = vrot.lane.b32.xlu1 %v3676_v1, %s3289_s1 }
 0xbb5   :  { %1911 = vrot.lane.b32.xlu1 %v3676_v1, %s3290_s24 }
 0xc1b   :  { %v1575_v2 = vpop.permute.xlu1 %1574  ;;  %v1407_v3 = vpop.permute.xlu0 %1406 }
 0xc1c   :  { %3038 = vmatpush3.xpose.msk.msra.mxu1 %vm229_vm2, %v1407_v3  ;;  %3048 = vmatpush3.xpose.msk.msra.mxu0 %vm229_vm2, %v1575_v2 }
 0xc1d   :  { %3057 = vmatprep.subr.mxu0 %v3286_v34  ;;  %3042 = vmatprep.subr.mxu1 %v3286_v34 }
 0xc1f   :  { %v1573_v4 = vpop.permute.xlu1 %1572  ;;  %3040 = vmatmul.mubr.msk.f32.vlgmr.msra.gmra.mxu1 %vm229_vm2, %v3670_v63  ;;  %v1914_v6 = vpop.permute.xlu0 %1913 }
 0xc20   :  { %3050 = vmatmul.mubr.msk.f32.vlgmr.msra.gmra.mxu0 %vm229_vm2, %v1573_v4  ;;  %3044 = vmatprep.mubr.msk.f32.mxu1 %vm3287_vm1, %v3286_v34 }
 0xc21   :  { %3059 = vmatprep.mubr.msk.f32.mxu0 %vm3287_vm1, %v3286_v34 }
 0xc23   :  { %v1746_v5 = vpop.permute.xlu1 %1745 }
 0xc24   :  { %3058 = vmatpush3.xpose.msk.msra.mxu0 %vm229_vm2, %v1746_v5 }
 0xc25   :  { %3067 = vmatprep.subr.mxu0 %v3286_v34 }
 0xc27   :  { %3060 = vmatmul.mubr.msk.f32.vlgmr.msra.gmra.mxu0 %vm229_vm2, %v3676_v1  ;;  %v1912_v7 = vpop.permute.xlu1 %1911 }
 0xc28   :  { %3068 = vmatpush3.xpose.msk.msra.mxu0 %vm229_vm2, %v1914_v6  ;;  %3069 = vmatprep.mubr.msk.f32.mxu0 %vm3287_vm1, %v3286_v34 }
 0xc2b   :  { %3070 = vmatmul.mubr.msk.f32.vlgmr.msra.gmra.mxu0 %vm229_vm2, %v1912_v7 }
 0xcdf   :  { %v1478_v8 = vpop.f32.mrf.mxu1 }
 0xce0   :  { %v1482_v9 = vmul.f32 0.25, %v1478_v8  ;;  %v1646_v10 = vpop.f32.mrf.mxu0 }
 0xce1   :  { %v1650_v11 = vmul.f32 0.25, %v1646_v10  ;;  %v3041_v12 = vpop.f32.mrf.mxu1 }
 0xce2   :  { %v3051_v13 = vpop.f32.mrf.mxu0  ;;  %v1483_v14 = vadd.f32 %v1482_v9, %v3504_v52  ;;  %v2798_v12 = vld [vmem:[%s3883_s6 + $0x30] sm:$0xff] }
 0xce3   :  { %v1651_v15 = vadd.f32 %v1650_v11, %v3504_v52  ;;  %v2799_v11 = vld [vmem:[%s3883_s6 + $0x38] sm:$0xff]  ;;  %v2797_v13 = vld [vmem:[%s3883_s6 + $0x28] sm:$0xff] }
 0xce4   :  { %v1484_v16 = vsel %vm310_vm3, %v1483_v14, -inf  ;;  %3077 = vmatprep.subr.mxu0 %v2799_v11 }
 0xce5   :  { %1485 = vmax.xlane.f32.xlu0 %v1484_v16  ;;  %v1652_v17 = vsel %vm310_vm3, %v1651_v15, -inf  ;;  %3078 = vmatpush3.msra.mxu0 %v2799_v11 }
 0xce6   :  { %1653 = vmax.xlane.f32.xlu1 %v1652_v17  ;;  %3079 = vmatprep.subr.mxu0 %v2798_v12 }
 0xce7   :  { %v1817_v18 = vpop.f32.mrf.mxu0  ;;  %3080 = vmatpush3.msra.mxu0 %v2798_v12 }
 0xce8   :  { %v1821_v19 = vmul.f32 0.25, %v1817_v18  ;;  %3081 = vmatprep.subr.mxu0 %v2797_v13 }
 0xce9   :  { %v3061_v20 = vpop.f32.mrf.mxu0  ;;  %3082 = vmatpush3.msra.mxu0 %v2797_v13 }
 0xcea   :  { %v1822_v21 = vadd.f32 %v1821_v19, %v3511_v0 }
 0xceb   :  { %v1985_v22 = vpop.f32.mrf.mxu0 }
 0xcec   :  { %v1989_v23 = vmul.f32 0.25, %v1985_v22  ;;  %v1823_v33 = vsel %vm310_vm3, %v1822_v21, -inf }
 0xced   :  { %1824 = vmax.xlane.f32.xlu0 %v1823_v33  ;;  %v3071_v31 = vpop.f32.mrf.mxu0 }
 0xcee   :  { %v1990_v24 = vadd.f32 %v1989_v23, %v3511_v0 }
 0xcf0   :  { %v1991_v52 = vsel %vm310_vm3, %v1990_v24, -inf }
 0xcf1   :  { %1992 = vmax.xlane.f32.xlu0 %v1991_v52 }
 0xd6e   :  { %v1486_v25 = vpop.xlane.xlu0 %1485 }
 0xd6f   :  { %v1487_v26 = vsub.f32 %v1483_v14, %v1486_v25  ;;  %v1654_v27 = vpop.xlane.xlu1 %1653  ;;  %v2796_v14 = vld [vmem:[%s3883_s6 + $0x20] sm:$0xff]  ;;  %s2836_s6 = sld [smem:[#allocation3 + $0x1]] }
 0xd70   :  { %v1655_v28 = vsub.f32 %v1651_v15, %v1654_v27  ;;  %3083 = vmatprep.subr.mxu0 %v2796_v14 }
 0xd71   :  { %v1488_v29 = vmul.f32 1.442695, %v1487_v26  ;;  %3084 = vmatpush3.msra.mxu0 %v2796_v14 }
 0xd72   :  { %v1656_v30 = vmul.f32 1.442695, %v1655_v28 }
 0xd73   :  { %3185 = vpow2.f32 %v1488_v29 }
 0xd74   :  { %3187 = vpow2.f32 %v1656_v30 }
 0xd76   :  { %v1825_v32 = vpop.xlane.xlu0 %1824 }
 0xd77   :  { %v1826_v35 = vsub.f32 %v1822_v21, %v1825_v32  ;;  %v2801_v21 = vld [vmem:[%s3884_s7 + $0x1] ss:$0 sm:$0xff] }
 0xd79   :  { %v1827_v36 = vmul.f32 1.442695, %v1826_v35 }
 0xd7a   :  { %v1993_v39 = vpop.xlane.xlu0 %1992 }
 0xd7b   :  { %3189 = vpow2.f32 %v1827_v36  ;;  %v1994_v43 = vsub.f32 %v1990_v24, %v1993_v39 }
 0xd7d   :  { %v1995_v44 = vmul.f32 1.442695, %v1994_v43 }
 0xd7f   :  { %3191 = vpow2.f32 %v1995_v44 }
 0xd80   :  { %v3186_v37 = vpop.eup %3185 }
 0xd81   :  { %v3188_v40 = vpop.eup %3187  ;;  %v1490_v38 = vsel %vm310_vm3, %v3186_v37, 0.0 }
 0xd82   :  { %1491 = vadd.xlane.f32.xlu0 %v1490_v38  ;;  %v1658_v0 = vsel %vm310_vm3, %v3188_v40, 0.0  ;;  %v2810_v38 = vld [vmem:[%s3887_s10 + $0x30] sm:$0xff] }
 0xd83   :  { %1659 = vadd.xlane.f32.xlu1 %v1658_v0  ;;  %v2809_v0 = vld [vmem:[%s3887_s10 + $0x28] sm:$0xff] }
 0xd88   :  { %v3190_v41 = vpop.eup %3189 }
 0xd89   :  { %v1829_v42 = vsel %vm310_vm3, %v3190_v41, 0.0 }
 0xd8a   :  { %1830 = vadd.xlane.f32.xlu0 %v1829_v42 }
 0xd8c   :  { %v3192_v45 = vpop.eup %3191 }
 0xd8d   :  { %v1997_v47 = vsel %vm310_vm3, %v3192_v45, 0.0 }
 0xd94   :  { %1663 = vrot.lane.b32.xlu1 %v3670_v63, %s3291_s27 }
 0xd98   :  { %1834 = vrot.lane.b32.xlu1 %v3676_v1, %s3292_s3 }
 0xda0   :  { %1495 = vrot.lane.b32.xlu0 %v3670_v63, %s3292_s3 }
 0xdbc   :  { %1998 = vadd.xlane.f32.xlu1 %v1997_v47 }
 0xdcd   :  { %2002 = vrot.lane.b32.xlu1 %v3676_v1, %s3291_s27 }
 0xe0b   :  { %v1492_v48 = vpop.xlane.xlu0 %1491 }
 0xe0c   :  { %3193 = vrcp.f32 %v1492_v48  ;;  %v1660_v50 = vpop.xlane.xlu1 %1659 }
 0xe0d   :  { %3195 = vrcp.f32 %v1660_v50  ;;  %v2806_v50 = vld [vmem:[%s3885_s8 + $0x1] ss:$0 sm:$0xff] }
 0xe10   :  { %v1664_v55 = vpop.permute.xlu1 %1663 }
 0xe13   :  { %v1831_v51 = vpop.xlane.xlu0 %1830 }
 0xe14   :  { %3197 = vrcp.f32 %v1831_v51  ;;  %v1835_v61 = vpop.permute.xlu1 %1834 }
 0xe17   :  { %v1496_v53 = vpop.permute.xlu0 %1495 }
 0xe18   :  { %3043 = vmatpush3.msra.mxu1 %v1496_v53  ;;  %v2807_v53 = vld [vmem:[%s3886_s9 + $0x1] ss:$0 sm:$0xff] }
 0xe19   :  { %v3194_v54 = vpop.eup %3193  ;;  %3052 = vmatprep.subr.mxu1 %v3286_v34 }
 0xe1a   :  { %v1494_v56 = vmul.f32 %v3194_v54, %v3186_v37  ;;  %v3196_v57 = vpop.eup %3195 }
 0xe1b   :  { %v1662_v60 = vmul.f32 %v3196_v57, %v3188_v40 }
 0xe1c   :  { %3045 = vmatmul.mubr.msk.f32.vlgmr.msra.gmra.mxu1 %vm310_vm3, %v1494_v56 }
 0xe1d   :  { %3053 = vmatpush3.msra.mxu1 %v1664_v55  ;;  %3054 = vmatprep.mubr.msk.f32.mxu1 %vm3287_vm1, %v3286_v34 }
 0xe1e   :  { %3062 = vmatprep.subr.mxu1 %v3286_v34 }
 0xe20   :  { %3055 = vmatmul.mubr.msk.f32.vlgmr.msra.gmra.mxu1 %vm310_vm3, %v1662_v60 }
 0xe21   :  { %v3198_v62 = vpop.eup %3197  ;;  %3063 = vmatpush3.msra.mxu1 %v1835_v61  ;;  %3064 = vmatprep.mubr.msk.f32.mxu1 %vm3287_vm1, %v3286_v34 }
 0xe22   :  { %v1833_v63 = vmul.f32 %v3198_v62, %v3190_v41  ;;  %3072 = vmatprep.subr.mxu1 %v3286_v34  ;;  %v2808_v41 = vld [vmem:[%s3887_s10 + $0x20] sm:$0xff]  ;;  %v2823_v62 = vld [vmem:[%s3889_s12 + $0x78] sm:$0xff] }
 0xe23   :  { %3099 = vmatprep.subr.mxu0 %v2823_v62 }
 0xe24   :  { %3065 = vmatmul.mubr.msk.f32.vlgmr.msra.gmra.mxu1 %vm310_vm3, %v1833_v63  ;;  %v2822_v63 = vld [vmem:[%s3889_s12 + $0x70] sm:$0xff] }
 0xe25   :  { %3074 = vmatprep.mubr.msk.f32.mxu1 %vm3287_vm1, %v3286_v34 }
 0xe45   :  { %v1999_v1 = vpop.xlane.xlu1 %1998 }
 0xe46   :  { %3199 = vrcp.f32 %v1999_v1  ;;  %v2821_v1 = vld [vmem:[%s3889_s12 + $0x68] sm:$0xff] }
 0xe49   :  { %v2003_v2 = vpop.permute.xlu1 %2002 }
 0xe4a   :  { %3073 = vmatpush3.msra.mxu1 %v2003_v2  ;;  %v2820_v2 = vld [vmem:[%s3889_s12 + $0x60] sm:$0xff] }
 0xe53   :  { %v3200_v3 = vpop.eup %3199 }
 0xe54   :  { %v2001_v4 = vmul.f32 %v3200_v3, %v3192_v45  ;;  %v2819_v3 = vld [vmem:[%s3889_s12 + $0x58] sm:$0xff] }
 0xe56   :  { %3075 = vmatmul.mubr.msk.f32.vlgmr.msra.gmra.mxu1 %vm310_vm3, %v2001_v4  ;;  %v2818_v4 = vld [vmem:[%s3889_s12 + $0x50] sm:$0xff] }
 0xedc   :  { %v1567_v5 = vpop.f32.mrf.mxu1 }
 0xedd   :  { %1571 = vst.msk [vmem:[#allocation2] sm:$0xff] %vm229_vm2, %v1567_v5  ;;  %v2817_v5 = vld [vmem:[%s3889_s12 + $0x48] sm:$0xff] }
 0xede   :  { %v3046_v6 = vpop.f32.mrf.mxu1 }
 0xedf   :  { %v2816_v6 = vld [vmem:[%s3889_s12 + $0x40] sm:$0xff] }
 0xee0   :  { %v1735_v7 = vpop.f32.mrf.mxu1 }
 0xee1   :  { %1740 = vrot.lane.b32.xlu0 %v1735_v7, %s3293_s28  ;;  %v2813_v7 = vld [vmem:[%s3888_s11 + $0x1] ss:$0 sm:$0xff] }
 0xee2   :  { %v3056_v8 = vpop.f32.mrf.mxu1 }
 0xee4   :  { %v1906_v9 = vpop.f32.mrf.mxu1 }
 0xee5   :  { %1910 = vst.msk [vmem:[#allocation2 + $0x8] sm:$0xff] %vm229_vm2, %v1906_v9 }
 0xee6   :  { %v3066_v10 = vpop.f32.mrf.mxu1 }
 0xf16   :  { %v2074_v15 = vpop.f32.mrf.mxu1 }
 0xf17   :  { %2079 = vrot.lane.b32.xlu1 %v2074_v15, %s3293_s28 }
 0xf18   :  { %v3076_v16 = vpop.f32.mrf.mxu1 }
 0xf53   :  { %v1741_v17 = vpop.permute.xlu0 %1740 }
 0xf54   :  { %1743 = vst.msk [vmem:[#allocation2] sm:$0xff] %vm570_vm4, %v1741_v17 }
 0xf5b   :  { %v2083_v18 = vld [vmem:[#allocation2] sm:$0xff] }
 0xf5c   :  { %3085 = vmatprep.mubr.msk.f32.mxu0 %vm85_vm0, %v2083_v18 }
 0xf89   :  { %v2080_v19 = vpop.permute.xlu1 %2079 }
 0xf8a   :  { %2082 = vst.msk [vmem:[#allocation2 + $0x8] sm:$0xff] %vm570_vm4, %v2080_v19 }
 0xf91   :  { %v2084_v20 = vld [vmem:[#allocation2 + $0x8] sm:$0xff] }
 0xf92   :  { %3086 = vmatmul.mubr.msk.f32.vlgmr.msra.gmra.mxu0 %vm85_vm0, %v2084_v20 }
 0xf93   :  { %3100 = vmatpush3.msra.mxu0 %v2823_v62 }
 0xf94   :  { %3101 = vmatprep.subr.mxu0 %v2822_v63 }
 0xf95   :  { %3102 = vmatpush3.msra.mxu0 %v2822_v63  ;;  %v2831_v63 = vld [vmem:[%s3892_s15 + $0x1] ss:$0 sm:$0xff] }
 0xf96   :  { %3103 = vmatprep.subr.mxu0 %v2821_v1 }
 0xf97   :  { %3104 = vmatpush3.msra.mxu0 %v2821_v1 }
 0xf98   :  { %3105 = vmatprep.subr.mxu0 %v2820_v2 }
 0xf99   :  { %3106 = vmatpush3.msra.mxu0 %v2820_v2 }
 0xf9a   :  { %3107 = vmatprep.subr.mxu0 %v2819_v3 }
 0xf9b   :  { %3108 = vmatpush3.msra.mxu0 %v2819_v3 }
 0xf9c   :  { %3109 = vmatprep.subr.mxu0 %v2818_v4 }
 0xf9d   :  { %3110 = vmatpush3.msra.mxu0 %v2818_v4 }
 0xf9e   :  { %3111 = vmatprep.subr.mxu0 %v2817_v5 }
 0xf9f   :  { %3112 = vmatpush3.msra.mxu0 %v2817_v5 }
 0xfa0   :  { %3113 = vmatprep.subr.mxu0 %v2816_v6 }
 0xfa1   :  { %3114 = vmatpush3.msra.mxu0 %v2816_v6 }
0x1052   :  { %v3087_v22 = vpop.f32.mrf.mxu0 }
0x1053   :  { %v2176_v23 = vadd.f32 %v3087_v22, %v2801_v21 }
0x1054   :  { %v2170_v33 = vpop.f32.mrf.mxu0 }
0x1055   :  { %v2171_v31 = vadd.f32 %v2801_v21, %v2170_v33  ;;  %v2180_v24 = vadd.f32 %v2176_v23, %v3653_v58 }
0x1057   :  { %v2188_v52 = vsel %vm85_vm0, %v2180_v24, 0.0  ;;  %v2179_v25 = vadd.f32 %v2171_v31, %v3655_v59  ;;  %v2811_v59 = vld [vmem:[%s3887_s10 + $0x38] sm:$0xff] }
0x1058   :  { %2189 = vadd.xlane.f32.xlu1 %v2188_v52  ;;  %3088 = vmatprep.subr.mxu1 %v2811_v59 }
0x1059   :  { %v2185_v26 = vsel %vm85_vm0, %v2179_v25, 0.0  ;;  %3089 = vmatpush3.msra.mxu1 %v2811_v59 }
0x105a   :  { %2186 = vadd.xlane.f32.xlu0 %v2185_v26  ;;  %3090 = vmatprep.subr.mxu1 %v2810_v38 }
0x105b   :  { %3091 = vmatpush3.msra.mxu1 %v2810_v38 }
0x105c   :  { %3092 = vmatprep.subr.mxu1 %v2809_v0 }
0x105d   :  { %3093 = vmatpush3.msra.mxu1 %v2809_v0 }
0x105e   :  { %3094 = vmatprep.subr.mxu1 %v2808_v41 }
0x105f   :  { %3095 = vmatpush3.msra.mxu1 %v2808_v41 }
0x1060   :  { %3118 = vmatprep.subr.mxu1 %v3286_v34 }
0x10e1   :  { %v2190_v27 = vpop.xlane.xlu1 %2189 }
0x10e2   :  { %v2192_v28 = vmul.f32 0.03125, %v2190_v27  ;;  %v2825_v27 = vld [vmem:[%s3890_s13 + $0x1] ss:$0 sm:$0xff] }
0x10e3   :  { %v2187_v29 = vpop.xlane.xlu0 %2186 }
0x10e4   :  { %v2191_v30 = vmul.f32 0.03125, %v2187_v29  ;;  %v2194_v32 = vsub.f32 %v2180_v24, %v2192_v28 }
0x10e6   :  { %v2193_v35 = vsub.f32 %v2179_v25, %v2191_v30  ;;  %v2196_v40 = vmul.f32 %v2194_v32, %v2194_v32 }
0x10e8   :  { %v2195_v36 = vmul.f32 %v2193_v35, %v2193_v35  ;;  %v2200_v58 = vsel %vm85_vm0, %v2196_v40, 0.0 }
0x10ea   :  { %v2197_v37 = vsel %vm85_vm0, %v2195_v36, 0.0 }
0x10eb   :  { %2198 = vadd.xlane.f32.xlu0 %v2197_v37 }
0x10ef   :  { %2201 = vadd.xlane.f32.xlu0 %v2200_v58 }
0x1174   :  { %v2199_v42 = vpop.xlane.xlu0 %2198 }
0x1175   :  { %v2203_v39 = vmul.f32 0.03125, %v2199_v42 }
0x1177   :  { %v2205_v43 = vadd.f32 1e-12, %v2203_v39 }
0x1178   :  { %v2202_v44 = vpop.xlane.xlu0 %2201 }
0x1179   :  { %3201 = vrsqrt.f32 %v2205_v43  ;;  %v2204_v45 = vmul.f32 0.03125, %v2202_v44 }
0x117b   :  { %v2206_v47 = vadd.f32 1e-12, %v2204_v45 }
0x117d   :  { %3203 = vrsqrt.f32 %v2206_v47 }
0x1186   :  { %v3202_v48 = vpop.eup %3201 }
0x1187   :  { %v2209_v51 = vmul.f32 %v3202_v48, %v2193_v35 }
0x1189   :  { %v2217_v54 = vmul.f32 %v2806_v50, %v2209_v51 }
0x118a   :  { %v3204_v55 = vpop.eup %3203 }
0x118b   :  { %v2210_v56 = vmul.f32 %v3204_v55, %v2194_v32  ;;  %v3786_v57 = vadd.f32 %v2807_v53, %v2217_v54 }
0x118d   :  { %v2218_v60 = vmul.f32 %v2806_v50, %v2210_v56  ;;  %3096 = vmatprep.mubr.msk.f32.mxu1 %vm85_vm0, %v3786_v57  ;;  %v2830_v56 = vld [vmem:[%s3891_s14 + $0x1] ss:$0 sm:$0xff] }
0x118f   :  { %v2226_v61 = vadd.f32 %v2807_v53, %v2218_v60  ;;  %v2492_v60 = vmul.u32 8, %v3501_v49 }
0x1191   :  { %3097 = vmatmul.mubr.msk.f32.vlgmr.msra.gmra.mxu1 %vm85_vm0, %v2226_v61 }
0x1192   :  { %3122 = vmatprep.mubr.msk.f32.mxu1 %vm3287_vm1, %v3286_v34 }
0x1251   :  { %v3098_v8 = vpop.f32.mrf.mxu1 }
0x1252   :  { %v2318_v9 = vadd.f32 %v3098_v8, %v2813_v7  ;;  %v2570_v8 = vld [vmem:[%s3893_s16 + $0x8] sm:$0xff] }
0x1253   :  { %v2312_v10 = vpop.f32.mrf.mxu1 }
0x1254   :  { %v2322_v11 = vmul.f32 %v2318_v9, %v2318_v9  ;;  %v2313_v12 = vadd.f32 %v2813_v7, %v2312_v10  ;;  %v2571_v7 = vld [vmem:[%s3893_s16 + $0x10] sm:$0xff] }
0x1256   :  { %v2324_v13 = vmul.f32 %v2322_v11, %v2318_v9  ;;  %v2321_v14 = vmul.f32 %v2313_v12, %v2313_v12 }
0x1258   :  { %v2326_v15 = vmul.f32 0.044715, %v2324_v13  ;;  %v2323_v16 = vmul.f32 %v2321_v14, %v2313_v12  ;;  %v2670_v14 = vstv %s2667_s29 }
0x125a   :  { %v2328_v17 = vadd.f32 %v2326_v15, %v2318_v9  ;;  %v2325_v18 = vmul.f32 0.044715, %v2323_v16  ;;  %v2675_v16 = vstv %s2836_s6 }
0x125c   :  { %v2330_v19 = vmul.f32 0.7978846, %v2328_v17  ;;  %v2327_v20 = vadd.f32 %v2325_v18, %v2313_v12 }
0x125e   :  { %3205 = vtanh.f32 %v2330_v19  ;;  %v2329_v21 = vmul.f32 0.7978846, %v2327_v20  ;;  %v2834_v20 = vld [vmem:[%s3894_s17] ss:$0 sm:$0xff]  ;;  %s3295_s17 = smov [#allocation7]  }
0x125f   :  { %s2707_s7 = sshll.u32 %s3295_s17, 4  ;;  %s2708_s7 = int_to_ptr.vmem [resolvable:$true] %s2707_s7 }
0x1260   :  { %3207 = vtanh.f32 %v2329_v21  ;;  %s3229_s28 = scalar_lea.vmem %s2708_s7, 768  ;;  %p3234_p6 = scmp.lt.s32.totalorder %s2708_s7, %s2708_s7 }
0x1261   :  { %p3230_p5 = scmp.ne.s32.totalorder %s2708_s7, %s3229_s28  ;;  %p3235_p7 = scmp.lt.s32.totalorder %s3229_s28, %s3229_s28 }
0x1263   :  { %p3236_p8 = por %p3235_p7, %p3234_p6 }
0x1265   :  { %p3237_p9 = pnand %p3236_p8, %p3230_p5 }
0x126b   :  { %v3206_v22 = vpop.eup %3205 }
0x126c   :  { %v2334_v23 = vadd.f32 1.0, %v3206_v22 }
0x126d   :  { %v3208_v33 = vpop.eup %3207 }
0x126e   :  { %v2333_v31 = vadd.f32 1.0, %v3208_v33  ;;  %v2336_v24 = vmul.f32 0.5, %v2334_v23 }
0x1270   :  { %v2335_v52 = vmul.f32 0.5, %v2333_v31  ;;  %v2338_v26 = vmul.f32 %v2336_v24, %v2318_v9  ;;  %v2569_v9 = vld [vmem:[%s3893_s16] sm:$0xff] }
0x1272   :  { %v2337_v25 = vmul.f32 %v2335_v52, %v2313_v12  ;;  %v3294_v12 = vmov 0  }
0x1273   :  { %v2669_v13 = vsel %vm2668_vm7, 1, %v3294_v12  ;;  %v2674_v15 = vsel %vm2673_vm8, 1, %v3294_v12 }
0x1274   :  { %3115 = vmatprep.mubr.msk.f32.mxu0 %vm1180_vm5, %v2337_v25  ;;  %v2671_v17 = vmul.u32 %v2670_v14, %v2669_v13  ;;  %v2676_v18 = vmul.u32 %v2675_v16, %v2674_v15 }
0x1275   :  { %3116 = vmatmul.mubr.msk.f32.vlgmr.msra.gmra.mxu0 %vm1180_vm5, %v2338_v26 }
0x1276   :  { %v2677_v19 = vadd.s32 %v2676_v18, %v2671_v17 }
0x1335   :  { %v3117_v28 = vpop.f32.mrf.mxu0 }
0x1336   :  { %v2434_v29 = vadd.f32 %v3117_v28, %v2825_v27 }
0x1337   :  { %v2428_v30 = vpop.f32.mrf.mxu0 }
0x1338   :  { %v2429_v32 = vadd.f32 %v2825_v27, %v2428_v30  ;;  %v2438_v35 = vadd.f32 %v2434_v29, %v2226_v61 }
0x133a   :  { %v2446_v36 = vsel %vm85_vm0, %v2438_v35, 0.0  ;;  %v2437_v37 = vadd.f32 %v2429_v32, %v3786_v57  ;;  %v2489_v57 = vand.u32 127, %v305_v46  ;;  %v2572_v46 = vld [vmem:[%s3893_s16 + $0x18] sm:$0xff] }
0x133b   :  { %2447 = vadd.xlane.f32.xlu0 %v2446_v36 }
0x133c   :  { %v2443_v40 = vsel %vm85_vm0, %v2437_v37, 0.0  ;;  %vm2493_vm6 = vcmp.eq.s32.totalorder %v2489_v57, %v2492_v60  ;;  %vm2678_vm9 = vcmp.eq.s32.totalorder %v2489_v57, %v2677_v19 }
0x133d   :  { %2444 = vadd.xlane.f32.xlu1 %v2443_v40  ;;  %v2832_v6 = vsel %vm2493_vm6, 1.0, %v3286_v34  ;;  %v2837_v22 = vsel %vm2678_vm9, 1.0, %v3286_v34 }
0x13c4   :  { %v2448_v58 = vpop.xlane.xlu0 %2447 }
0x13c5   :  { %v2450_v59 = vmul.f32 0.03125, %v2448_v58 }
0x13c6   :  { %v2445_v38 = vpop.xlane.xlu1 %2444 }
0x13c7   :  { %v2452_v0 = vsub.f32 %v2438_v35, %v2450_v59  ;;  %v2449_v41 = vmul.f32 0.03125, %v2445_v38 }
0x13c9   :  { %v2451_v42 = vsub.f32 %v2437_v37, %v2449_v41  ;;  %v2454_v39 = vmul.f32 %v2452_v0, %v2452_v0 }
0x13cb   :  { %v2458_v43 = vsel %vm85_vm0, %v2454_v39, 0.0  ;;  %v2453_v44 = vmul.f32 %v2451_v42, %v2451_v42 }
0x13cc   :  { %2459 = vadd.xlane.f32.xlu0 %v2458_v43 }
0x13cd   :  { %v2455_v45 = vsel %vm85_vm0, %v2453_v44, 0.0 }
0x13ce   :  { %2456 = vadd.xlane.f32.xlu1 %v2455_v45 }
0x1455   :  { %v2460_v47 = vpop.xlane.xlu0 %2459 }
0x1456   :  { %v2462_v48 = vmul.f32 0.03125, %v2460_v47 }
0x1457   :  { %v2457_v50 = vpop.xlane.xlu1 %2456 }
0x1458   :  { %v2464_v51 = vadd.f32 1e-12, %v2462_v48  ;;  %v2461_v53 = vmul.f32 0.03125, %v2457_v50 }
0x145a   :  { %3209 = vrsqrt.f32 %v2464_v51  ;;  %v2463_v54 = vadd.f32 1e-12, %v2461_v53 }
0x145c   :  { %3211 = vrsqrt.f32 %v2463_v54 }
0x1467   :  { %v3210_v55 = vpop.eup %3209 }
0x1468   :  { %v2468_v61 = vmul.f32 %v3210_v55, %v2452_v0 }
0x1469   :  { %v3212_v62 = vpop.eup %3211 }
0x146a   :  { %v2476_v1 = vmul.f32 %v2830_v56, %v2468_v61  ;;  %v2467_v2 = vmul.f32 %v3212_v62, %v2451_v42 }
0x146c   :  { %v2484_v3 = vadd.f32 %v2831_v63, %v2476_v1  ;;  %v2475_v4 = vmul.f32 %v2830_v56, %v2467_v2 }
0x146e   :  { %2487 = vst.msk [vmem:[#allocation7 + $0x28] sm:$0xff] %vm85_vm0, %v2484_v3  ;;  %3119 = vmatpush3.msra.mxu1 %v2484_v3  ;;  %v2483_v5 = vadd.f32 %v2831_v63, %v2475_v4 }
0x146f   :  { %3120 = vmatprep.subr.mxu1 %v3286_v34 }
0x1470   :  { %2486 = vst.msk [vmem:[#allocation7 + $0x20] sm:$0xff] %vm85_vm0, %v2483_v5  ;;  %3121 = vmatpush3.msra.mxu1 %v2483_v5 }
0x1471   :  { %3123 = vmatmul.mubr.msk.f32.vlgmr.msra.gmra.mxu1 %vm229_vm2, %v2832_v6  ;;  %3125 = vmatprep.subr.mxu1 %v3286_v34 }
0x1472   :  { %3126 = vmatpush3.msra.mxu1 %v2572_v46  ;;  %3133 = vmatprep.mubr.msk.f32.mxu1 %vm3287_vm1, %v3286_v34 }
0x1473   :  { %3127 = vmatprep.subr.mxu1 %v3286_v34 }
0x1474   :  { %3128 = vmatpush3.msra.mxu1 %v2571_v7 }
0x1475   :  { %3129 = vmatprep.subr.mxu1 %v3286_v34 }
0x1476   :  { %3130 = vmatpush3.msra.mxu1 %v2570_v8 }
0x1477   :  { %3131 = vmatprep.subr.mxu1 %v3286_v34 }
0x1478   :  { %3132 = vmatpush3.msra.mxu1 %v2569_v9 }
0x1531   :  { %v2565_v10 = vpop.f32.mrf.mxu1 }
0x1532   :  { %3134 = vmatmul.mubr.msk.f32.vlgmr.msra.gmra.mxu1 %vm85_vm0, %v2565_v10 }
0x1533   :  { %v3124_v11 = vpop.f32.mrf.mxu1 }
0x15f2   :  { %v2649_v21 = vpop.f32.mrf.mxu1 }
0x15f3   :  { %v2650_v23 = vadd.f32 %v2834_v20, %v2649_v21 }
0x15f4   :  { %v3135_v33 = vpop.f32.mrf.mxu1 }
0x15f5   :  { %v2655_v49 = vsel %vm2653_vm10, %v2650_v23, -inf  ;;  %2654 = vst.msk [vmem:[#allocation8] sm:$0x3] %vm2653_vm10, %v2650_v23  ;;  %v2681_v31 = vmul.f32 %v2837_v22, %v2650_v23 }
0x15f6   :  { %2656 = vmax.xlane.f32.xlu0 %v2655_v49 }
0x15f7   :  { %v2682_v24 = vsel %vm2653_vm10, %v2681_v31, 0.0 }
0x15fa   :  { %2683 = vadd.xlane.f32.xlu0 %v2682_v24 }
0x167f   :  { %v2657_v52 = vpop.xlane.xlu0 %2656 }
0x1680   :  { %v2658_v25 = vsub.f32 %v2650_v23, %v2657_v52 }
0x1682   :  { %v2659_v26 = vmul.f32 1.442695, %v2658_v25 }
0x1683   :  { %v2684_v35 = vpop.xlane.xlu0 %2683 }
0x1684   :  { %3213 = vpow2.f32 %v2659_v26 }
0x1691   :  { %v3214_v27 = vpop.eup %3213 }
0x1692   :  { %v2661_v28 = vsel %vm2653_vm10, %v3214_v27, 0.0 }
0x1693   :  { %2662 = vadd.xlane.f32.xlu1 %v2661_v28 }
0x171c   :  { %v2663_v29 = vpop.xlane.xlu1 %2662 }
0x171d   :  { %3215 = vlog2.f32 %v2663_v29 }
0x172a   :  { %v3216_v30 = vpop.eup %3215 }
0x172b   :  { %v2665_v32 = vmul.f32 0.6931472, %v3216_v30 }
0x172d   :  { %v2666_v34 = vadd.f32 %v2665_v32, %v2657_v52 }
0x172f   :  { %v2685_v36 = vsub.f32 %v2666_v34, %v2684_v35 }
0x1731   :  { %v2687_v37 = vsel %vm2686_vm11, %v2685_v36, 0.0 }
0x1732   :  { %2688 = vadd.xlane.f32.xlu1 %v2687_v37 }
0x1733   :  { %3240 = shalt.err (!%p3237_p9)
}
0x1734   :  { %s3296_s4 = smov 128   ;;  %s3297_s18 = smov 8  }
0x1735   :  { %2713 = dma.vmem_to_hbm [thread:$0]  %s2708_s7, 768, %s3896_s19, [#allocation4], %s3296_s4, %s3296_s4, %s3297_s18  }
0x1736   :  { %s3298_s2 = smov [#allocation8]  }
0x1737   :  { %s2720_s25 = sshll.u32 %s3298_s2, 4  ;;  %s2721_s25 = int_to_ptr.vmem [resolvable:$true] %s2720_s25 }
0x1738   :  { %s3249_s5 = scalar_lea.vmem %s2721_s25, 32  ;;  %p3254_p11 = scmp.lt.s32.totalorder %s2721_s25, %s2721_s25 }
0x1739   :  { %p3250_p10 = scmp.ne.s32.totalorder %s2721_s25, %s3249_s5  ;;  %p3255_p12 = scmp.lt.s32.totalorder %s3249_s5, %s3249_s5 }
0x173b   :  { %p3256_p13 = por %p3255_p12, %p3254_p11 }
0x173d   :  { %p3257_p0 = pnand %p3256_p13, %p3250_p10 }
0x173f   :  { %3260 = shalt.err (!%p3257_p0)
}
0x1740   :  { %2723 = dma.vmem_to_hbm [thread:$0]  %s2721_s25, 32, %s3897_s20, [#allocation9]  }
0x1741   :  { %s3299_s23 = smov [#allocation10]  }
0x17bb   :  { %v2689_v40 = vpop.xlane.xlu1 %2688 }
0x17bc   :  { %v2690_v58 = vrot.slane %v2689_v40, 4 }
0x17be   :  { %v2691_v59 = vadd.f32 %v2690_v58, %v2689_v40 }
0x17c0   :  { %v2692_v38 = vrot.slane %v2691_v59, 2 }
0x17c2   :  { %v2693_v0 = vadd.f32 %v2692_v38, %v2691_v59 }
0x17c4   :  { %v2694_v41 = vrot.slane %v2693_v0, 1 }
0x17c6   :  { %v2695_v42 = vadd.f32 %v2694_v41, %v2693_v0 }
0x17c8   :  { %3136 = vpush %v2695_v42 }
0x17f9   :  { %s3137_s19 = spop %3136 }
0x17fa   :  { %s2699_s13 = smul.f32 0.5, %s3137_s19 }
0x17fc   :  { %2701 = sst [smem:[#allocation10]] %s2699_s13 }
0x17fd   :  { %2731 = dma.smem_to_hbm %s3299_s23, 16, %s3898_s21, [#allocation5]  }
0x17fe   :  { %3279 = dma.done.wait [#allocation4], 768  }
0x17ff   :  { %3280 = vsyncadd [#allocation4], 4294966528 }
0x1800   :  { %3281 = dma.done.wait [#allocation9], 32  }
0x1801   :  { %3282 = vsyncadd [#allocation9], 4294967264 }
0x1802   :  { %3283 = dma.done.wait [#allocation5], 16  }
0x1803   :  { %3284 = vsyncadd [#allocation5], 4294967280 }
0x1804   :  { %2741 = sfence }
0x1805   :  { %2742 = vsyncpa [#allocation4], 1 }
0x1806   :  { %2743 = vsyncpa [#allocation9], 1 }
0x1807   :  { %2744 = vsyncpa [#allocation5], 1 }
0x1808   :  { %2745 = vsyncpa [#allocation6], 1 }

</bundles_post_ra>
